<compile_context>
chip_gen: v7x
topology: tpu7x:2x2x1
jax: 0.10.0
libtpu: 0.0.40
codegen_flags: <defaults>
</compile_context>

<pallas_src>
import functools

import jax
import jax.numpy as jnp
from jax.experimental import pallas as pl
from jax.experimental.pallas import tpu as pltpu


# ---------------------------------------------------------------------------
# Fused kernel: upsample-conv + decoder-conv for one image (coarse resolution).
# ---------------------------------------------------------------------------
def _fused_decoder_kernel(x_ref, s_ref, w1_ref, b1_ref, w2s_ref, w2t_ref, b2_ref,
                          o_ref, *, Hc, Wc):
    M = Hc * Wc
    C4 = o_ref.shape[-1]

    # Column-parity masks, computed once and reused by all three conv passes.
    col = jax.lax.broadcasted_iota(jnp.int32, (M, 1), 0) % Wc
    not_left = col > 0            # reading column c-1 is inside the image
    not_right = col < (Wc - 1)    # reading column c+1 is inside the image

    def conv_acc(img_bf16, w_ref_, acc):
        # img_bf16: ((Hc+4)*Wc, Cin) bf16, rows flattened, 2 zero rows top/bottom.
        zero = jnp.zeros((), img_bf16.dtype)
        for kh in range(3):
            for kw in range(3):
                start = (kh + 1) * Wc + (kw - 1)
                sl = img_bf16[start:start + M, :]
                if kw == 0:
                    sl = jnp.where(not_left, sl, zero)
                elif kw == 2:
                    sl = jnp.where(not_right, sl, zero)
                acc = acc + jnp.dot(sl, w_ref_[kh * 3 + kw],
                                    preferred_element_type=jnp.float32)
        return acc

    x_bf = x_ref[...]     # bf16, stays bf16 (MXU input precision)
    s_bf = s_ref[...]     # bf16

    # --- upsample ConvBlock: nearest-2x upsample + conv3x3 + ReLU (sub-pixel form)
    acc1 = conv_acc(x_bf, w1_ref, jnp.zeros((M, C4), jnp.float32))
    t_bf = jnp.maximum(acc1 + b1_ref[...], 0.0).astype(jnp.bfloat16)

    # intermediate stays on-chip: pad with 2 zero rows top/bottom for the next conv
    zpad = jnp.zeros((2 * Wc, C4), jnp.bfloat16)
    t_pad = jnp.concatenate([zpad, t_bf, zpad], axis=0)

    # --- decoder ConvBlock on concat([skip, upsampled]) without materializing it
    acc2 = jnp.zeros((M, C4), jnp.float32)
    acc2 = conv_acc(s_bf, w2s_ref, acc2)       # skip half of the weights
    acc2 = conv_acc(t_pad, w2t_ref, acc2)      # upsample-branch half
    o_ref[...] = jnp.maximum(acc2 + b2_ref[...], 0.0).astype(o_ref.dtype)


def _decoder_block_pallas(x_flat, skip_flat, w1e, b1e, w2se, w2te, b2e, *, Hc, Wc):
    N, Mp, C = x_flat.shape
    C4 = w1e.shape[-1]
    M = Hc * Wc
    assert Mp == (Hc + 4) * Wc

    kernel = functools.partial(_fused_decoder_kernel, Hc=Hc, Wc=Wc)

    return pl.pallas_call(
        kernel,
        out_shape=jax.ShapeDtypeStruct((N, M, C4), jnp.float32),
        grid_spec=pltpu.PrefetchScalarGridSpec(
            num_scalar_prefetch=0,
            grid=(N,),
            in_specs=[
                pl.BlockSpec((None, Mp, C), lambda n: (n, 0, 0)),    # x (coarse, flat, H-padded)
                pl.BlockSpec((None, Mp, C4), lambda n: (n, 0, 0)),   # skip (space-to-depth, flat)
                pl.BlockSpec((9, C, C4), lambda n: (0, 0, 0)),       # effective upsample-conv weights
                pl.BlockSpec((1, C4), lambda n: (0, 0)),             # upsample-conv bias
                pl.BlockSpec((9, C4, C4), lambda n: (0, 0, 0)),      # decoder weights (skip half)
                pl.BlockSpec((9, C4, C4), lambda n: (0, 0, 0)),      # decoder weights (upsample half)
                pl.BlockSpec((1, C4), lambda n: (0, 0)),             # decoder bias
            ],
            out_specs=pl.BlockSpec((None, M, C4), lambda n: (n, 0, 0)),
        ),
        compiler_params=pltpu.CompilerParams(
            dimension_semantics=("parallel",),
            vmem_limit_bytes=32 * 1024 * 1024,
        ),
    )(x_flat, skip_flat, w1e, b1e, w2se, w2te, b2e)


# ---------------------------------------------------------------------------
# Wrapper-side weight transforms (tiny, done once) and layout plumbing.
# ---------------------------------------------------------------------------
def _effective_weights(up_w, up_b, dec_w, dec_b):
    C, F = up_w.shape[2], up_w.shape[3]
    f32 = jnp.float32

    # R[q, d, k]: fine tap d (dh=d-1) of fine-output row-parity q reads coarse
    # source row offset k-1  (nearest-2x upsample folded into the conv).
    R = jnp.array([[[1, 0, 0], [0, 1, 0], [0, 1, 0]],
                   [[0, 1, 0], [0, 1, 0], [0, 0, 1]]], f32)
    w1e = jnp.einsum('qdk,pel,decf->klcqpf', R, R, up_w.astype(f32)).reshape(9, C, 4 * F)
    b1e = jnp.tile(up_b.astype(f32), 4).reshape(1, 4 * F)

    # S[q, d, k, r]: fine tap d of fine-output parity q reads input parity r at
    # coarse offset k-1 (both tensors live at fine resolution for the decoder conv).
    S = jnp.zeros((2, 3, 3, 2), f32)
    S = S.at[0, 0, 0, 1].set(1.0).at[0, 1, 1, 0].set(1.0).at[0, 2, 1, 1].set(1.0)
    S = S.at[1, 0, 1, 0].set(1.0).at[1, 1, 1, 1].set(1.0).at[1, 2, 2, 0].set(1.0)
    w2_skip = dec_w[:, :, :F, :].astype(f32)     # decoder input channels 0..F-1  = skip
    w2_up = dec_w[:, :, F:, :].astype(f32)       # decoder input channels F..2F-1 = upsample branch
    w2se = jnp.einsum('qdkr,pels,decg->klrscqpg', S, S, w2_skip).reshape(9, 4 * F, 4 * F)
    w2te = jnp.einsum('qdkr,pels,decg->klrscqpg', S, S, w2_up).reshape(9, 4 * F, 4 * F)
    b2e = jnp.tile(dec_b.astype(f32), 4).reshape(1, 4 * F)

    bf16 = jnp.bfloat16
    return w1e.astype(bf16), b1e, w2se.astype(bf16), w2te.astype(bf16), b2e


def decoder_block_forward(x_nchw, skip_nchw, params):
    """DecoderBlock forward: upsample ConvBlock -> crop -> cat(skip, x) -> decoder ConvBlock.
    Inputs/outputs are NCHW (PyTorch convention)."""
    N, C, H, W = x_nchw.shape
    _, F, Hs, Ws = skip_nchw.shape

    if (Hs, Ws) != (2 * H, 2 * W):
        # TODO(synk): crop branch (upsampled output larger than skip, e.g. odd skip sizes)
        # is not fused; only the standard skip == 2x-input U-Net case is implemented.
        raise NotImplementedError("Pallas DecoderBlock requires skip spatial == 2x input spatial")

    w1e, b1e, w2se, w2te, b2e = _effective_weights(
        params["up_w"], params["up_b"], params["dec_w"], params["dec_b"])

    # NCHW -> NHWC (XLA fuses these layout copies with the pad/flatten/bf16 cast below).
    x = jnp.transpose(x_nchw, (0, 2, 3, 1))
    skip = jnp.transpose(skip_nchw, (0, 2, 3, 1))

    # skip -> space-to-depth (2x2 parity blocks as channels, order (row-par, col-par, f)).
    skip4 = skip.reshape(N, H, 2, W, 2, F).transpose(0, 1, 3, 2, 4, 5).reshape(N, H, W, 4 * F)

    def _prep(a):  # zero-pad 2 rows top/bottom, flatten rows, cast to bf16 for DMA
        a = jnp.pad(a, ((0, 0), (2, 2), (0, 0), (0, 0)))
        return a.reshape(N, (H + 4) * W, a.shape[-1]).astype(jnp.bfloat16)

    y4 = _decoder_block_pallas(_prep(x), _prep(skip4), w1e, b1e, w2se, w2te, b2e, Hc=H, Wc=W)

    # depth-to-space (undo parity blocking) and back to NCHW.
    y = y4.reshape(N, H, W, 2, 2, F).transpose(0, 1, 3, 2, 4, 5).reshape(N, 2 * H, 2 * W, F)
    return jnp.transpose(y, (0, 3, 1, 2))


# ---------------------------------------------------------------------------
# Pure-JAX f32 reference of the same module (for a loose numerical check).
# ---------------------------------------------------------------------------
def _conv3x3_relu_ref(x_nhwc, w_hwio, b):
    y = jax.lax.conv_general_dilated(x_nhwc, w_hwio, window_strides=(1, 1), padding="SAME",
                                     dimension_numbers=("NHWC", "HWIO", "NHWC"))
    return jnp.maximum(y + b, 0.0)


def decoder_block_reference(x_nchw, skip_nchw, params):
    x = jnp.transpose(x_nchw, (0, 2, 3, 1))
    skip = jnp.transpose(skip_nchw, (0, 2, 3, 1))
    x = jnp.repeat(jnp.repeat(x, 2, axis=1), 2, axis=2)          # nearest 2x upsample
    x = _conv3x3_relu_ref(x, params["up_w"], params["up_b"])
    x = x[:, :skip.shape[1], :skip.shape[2], :]
    z = jnp.concatenate([skip, x], axis=-1)
    z = _conv3x3_relu_ref(z, params["dec_w"], params["dec_b"])
    return jnp.transpose(z, (0, 3, 1, 2))


def init_params(key, c_in, filters):
    k1, k2, k3, k4 = jax.random.split(key, 4)
    scale_up = 1.0 / jnp.sqrt(9.0 * c_in)
    scale_dec = 1.0 / jnp.sqrt(9.0 * (2 * filters))
    return {
        "up_w": jax.random.normal(k1, (3, 3, c_in, filters), jnp.float32) * scale_up,
        "up_b": jax.random.normal(k2, (filters,), jnp.float32) * 0.01,
        "dec_w": jax.random.normal(k3, (3, 3, 2 * filters, filters), jnp.float32) * scale_dec,
        "dec_b": jax.random.normal(k4, (filters,), jnp.float32) * 0.01,
    }


if __name__ == "__main__":
    key = jax.random.PRNGKey(0)
    kx, ks, kp = jax.random.split(key, 3)

    batch, c_in, h, w = 2, 4, 8, 8
    filters = 8

    x = jax.random.normal(kx, (batch, c_in, h, w), jnp.float32)                   # NCHW
    skip = jax.random.normal(ks, (batch, filters, 2 * h, 2 * w), jnp.float32)     # NCHW
    params = init_params(kp, c_in, filters)

    fwd = jax.jit(decoder_block_forward)
    out = jax.block_until_ready(fwd(x, skip, params))

    assert out.shape == (batch, filters, 2 * h, 2 * w), out.shape
    assert bool(jnp.all(jnp.isfinite(out)))

    # kernel runs its matmuls in bf16 (f32 accumulation) -> compare loosely vs f32 ref
    ref = jax.block_until_ready(decoder_block_reference(x, skip, params))
    assert bool(jnp.allclose(out, ref, rtol=5e-2, atol=5e-2)), float(jnp.max(jnp.abs(out - ref)))

    print("KERNEL_OK")
</pallas_src>

<mosaic_0001>
module attributes {stable_mosaic.version = 11 : i64} {
  func.func @_fused_decoder_kernel(%arg0: i32, %arg1: memref<1x96x4xbf16, #tpu.memory_space<vmem>>, %arg2: memref<1x96x32xbf16, #tpu.memory_space<vmem>>, %arg3: memref<9x4x32xbf16, #tpu.memory_space<vmem>>, %arg4: memref<1x32xf32, #tpu.memory_space<vmem>>, %arg5: memref<9x32x32xbf16, #tpu.memory_space<vmem>>, %arg6: memref<9x32x32xbf16, #tpu.memory_space<vmem>>, %arg7: memref<1x32xf32, #tpu.memory_space<vmem>>, %arg8: memref<1x64x32xf32, #tpu.memory_space<vmem>>) attributes {dimension_semantics = [#tpu.dimension_semantics<parallel>], iteration_bounds = array<i64: 2>, scalar_prefetch = 0 : i64, scratch_operands = 0 : i64, tpu.core_type = #tpu.core_type<tc>, window_params = [{transform_indices = @transform_0, window_bounds = array<i64: 1, 96, 4>}, {transform_indices = @transform_1, window_bounds = array<i64: 1, 96, 32>}, {pipeline_mode = #tpu.pipeline_mode<synchronous>, transform_indices = @transform_2, window_bounds = array<i64: 9, 4, 32>}, {pipeline_mode = #tpu.pipeline_mode<synchronous>, transform_indices = @transform_3, window_bounds = array<i64: 1, 32>}, {pipeline_mode = #tpu.pipeline_mode<synchronous>, transform_indices = @transform_4, window_bounds = array<i64: 9, 32, 32>}, {pipeline_mode = #tpu.pipeline_mode<synchronous>, transform_indices = @transform_5, window_bounds = array<i64: 9, 32, 32>}, {pipeline_mode = #tpu.pipeline_mode<synchronous>, transform_indices = @transform_6, window_bounds = array<i64: 1, 32>}, {transform_indices = @transform_7, window_bounds = array<i64: 1, 64, 32>}]} {
    %0 = tpu.iota {dimensions = array<i32: 0>} : vector<64x1xi32>
    %c8_i32 = arith.constant 8 : i32
    %c0_i32 = arith.constant 0 : i32
    %1 = arith.cmpi eq, %c8_i32, %c0_i32 : i32
    %c1_i32 = arith.constant 1 : i32
    %2 = arith.select %1, %c1_i32, %c8_i32 : i32
    %3 = vector.broadcast %2 : i32 to vector<64x1xi32>
    %4 = arith.remsi %0, %3 : vector<64x1xi32>
    %c0_i32_0 = arith.constant 0 : i32
    %5 = vector.broadcast %c0_i32_0 : i32 to vector<64x1xi32>
    %6 = arith.cmpi ne, %4, %5 : vector<64x1xi32>
    %c0_i32_1 = arith.constant 0 : i32
    %7 = vector.broadcast %c0_i32_1 : i32 to vector<64x1xi32>
    %8 = arith.cmpi slt, %4, %7 : vector<64x1xi32>
    %c0_i32_2 = arith.constant 0 : i32
    %9 = arith.cmpi slt, %2, %c0_i32_2 : i32
    %10 = vector.broadcast %9 : i1 to vector<64x1xi1>
    %11 = vector.broadcast %10 : vector<64x1xi1> to vector<64x1xi1>
    %12 = arith.xori %8, %11 : vector<64x1xi1>
    %13 = arith.andi %12, %6 : vector<64x1xi1>
    %14 = vector.broadcast %2 : i32 to vector<64x1xi32>
    %15 = arith.addi %4, %14 : vector<64x1xi32>
    %16 = arith.select %13, %15, %4 : vector<64x1xi1>, vector<64x1xi32>
    %c0_i32_3 = arith.constant 0 : i32
    %17 = vector.broadcast %c0_i32_3 : i32 to vector<64x1xi32>
    %18 = arith.cmpi sgt, %16, %17 : vector<64x1xi32>
    %c7_i32 = arith.constant 7 : i32
    %19 = vector.broadcast %c7_i32 : i32 to vector<64x1xi32>
    %20 = arith.cmpi slt, %16, %19 : vector<64x1xi32>
    %c0 = arith.constant 0 : index
    %c0_4 = arith.constant 0 : index
    %c0_5 = arith.constant 0 : index
    %21 = vector.load %arg1[%c0, %c0_4, %c0_5] : memref<1x96x4xbf16, #tpu.memory_space<vmem>>, vector<1x96x4xbf16>
    %22 = vector.shape_cast %21 : vector<1x96x4xbf16> to vector<96x4xbf16>
    %c0_6 = arith.constant 0 : index
    %c0_7 = arith.constant 0 : index
    %c0_8 = arith.constant 0 : index
    %23 = vector.load %arg2[%c0_6, %c0_7, %c0_8] : memref<1x96x32xbf16, #tpu.memory_space<vmem>>, vector<1x96x32xbf16>
    %24 = vector.shape_cast %23 : vector<1x96x32xbf16> to vector<96x32xbf16>
    %cst = arith.constant 0.000000e+00 : f32
    %25 = vector.broadcast %cst : f32 to vector<64x32xf32>
    %26 = vector.extract_strided_slice %22 {offsets = [7, 0], sizes = [64, 4], strides = [1, 1]} : vector<96x4xbf16> to vector<64x4xbf16>
    %cst_9 = arith.constant 0.000000e+00 : bf16
    %27 = vector.shape_cast %18 : vector<64x1xi1> to vector<64x1xi1>
    %28 = vector.broadcast %27 : vector<64x1xi1> to vector<64x4xi1>
    %29 = vector.broadcast %cst_9 : bf16 to vector<64x4xbf16>
    %30 = arith.select %28, %26, %29 : vector<64x4xi1>, vector<64x4xbf16>
    %c0_10 = arith.constant 0 : index
    %c0_11 = arith.constant 0 : index
    %c0_12 = arith.constant 0 : index
    %31 = vector.load %arg3[%c0_10, %c0_11, %c0_12] : memref<9x4x32xbf16, #tpu.memory_space<vmem>>, vector<1x4x32xbf16>
    %32 = vector.shape_cast %31 : vector<1x4x32xbf16> to vector<4x32xbf16>
    %cst_13 = arith.constant dense<0.000000e+00> : vector<64x32xf32>
    %33 = tpu.matmul %30, %32, %cst_13 {dimension_numbers = #tpu.dot_dimension_numbers<[1], [0], [0], [1], [0, 0, 1, 1], [], []>} : vector<64x4xbf16>, vector<4x32xbf16>, vector<64x32xf32> -> vector<64x32xf32>
    %34 = arith.addf %25, %33 : vector<64x32xf32>
    %35 = vector.extract_strided_slice %22 {offsets = [8, 0], sizes = [64, 4], strides = [1, 1]} : vector<96x4xbf16> to vector<64x4xbf16>
    %c1 = arith.constant 1 : index
    %c0_14 = arith.constant 0 : index
    %c0_15 = arith.constant 0 : index
    %36 = vector.load %arg3[%c1, %c0_14, %c0_15] : memref<9x4x32xbf16, #tpu.memory_space<vmem>>, vector<1x4x32xbf16>
    %37 = vector.shape_cast %36 : vector<1x4x32xbf16> to vector<4x32xbf16>
    %cst_16 = arith.constant dense<0.000000e+00> : vector<64x32xf32>
    %38 = tpu.matmul %35, %37, %cst_16 {dimension_numbers = #tpu.dot_dimension_numbers<[1], [0], [0], [1], [0, 0, 1, 1], [], []>} : vector<64x4xbf16>, vector<4x32xbf16>, vector<64x32xf32> -> vector<64x32xf32>
    %39 = arith.addf %34, %38 : vector<64x32xf32>
    %40 = vector.extract_strided_slice %22 {offsets = [9, 0], sizes = [64, 4], strides = [1, 1]} : vector<96x4xbf16> to vector<64x4xbf16>
    %cst_17 = arith.constant 0.000000e+00 : bf16
    %41 = vector.shape_cast %20 : vector<64x1xi1> to vector<64x1xi1>
    %42 = vector.broadcast %41 : vector<64x1xi1> to vector<64x4xi1>
    %43 = vector.broadcast %cst_17 : bf16 to vector<64x4xbf16>
    %44 = arith.select %42, %40, %43 : vector<64x4xi1>, vector<64x4xbf16>
    %c2 = arith.constant 2 : index
    %c0_18 = arith.constant 0 : index
    %c0_19 = arith.constant 0 : index
    %45 = vector.load %arg3[%c2, %c0_18, %c0_19] : memref<9x4x32xbf16, #tpu.memory_space<vmem>>, vector<1x4x32xbf16>
    %46 = vector.shape_cast %45 : vector<1x4x32xbf16> to vector<4x32xbf16>
    %cst_20 = arith.constant dense<0.000000e+00> : vector<64x32xf32>
    %47 = tpu.matmul %44, %46, %cst_20 {dimension_numbers = #tpu.dot_dimension_numbers<[1], [0], [0], [1], [0, 0, 1, 1], [], []>} : vector<64x4xbf16>, vector<4x32xbf16>, vector<64x32xf32> -> vector<64x32xf32>
    %48 = arith.addf %39, %47 : vector<64x32xf32>
    %49 = vector.extract_strided_slice %22 {offsets = [15, 0], sizes = [64, 4], strides = [1, 1]} : vector<96x4xbf16> to vector<64x4xbf16>
    %cst_21 = arith.constant 0.000000e+00 : bf16
    %50 = vector.shape_cast %18 : vector<64x1xi1> to vector<64x1xi1>
    %51 = vector.broadcast %50 : vector<64x1xi1> to vector<64x4xi1>
    %52 = vector.broadcast %cst_21 : bf16 to vector<64x4xbf16>
    %53 = arith.select %51, %49, %52 : vector<64x4xi1>, vector<64x4xbf16>
    %c3 = arith.constant 3 : index
    %c0_22 = arith.constant 0 : index
    %c0_23 = arith.constant 0 : index
    %54 = vector.load %arg3[%c3, %c0_22, %c0_23] : memref<9x4x32xbf16, #tpu.memory_space<vmem>>, vector<1x4x32xbf16>
    %55 = vector.shape_cast %54 : vector<1x4x32xbf16> to vector<4x32xbf16>
    %cst_24 = arith.constant dense<0.000000e+00> : vector<64x32xf32>
    %56 = tpu.matmul %53, %55, %cst_24 {dimension_numbers = #tpu.dot_dimension_numbers<[1], [0], [0], [1], [0, 0, 1, 1], [], []>} : vector<64x4xbf16>, vector<4x32xbf16>, vector<64x32xf32> -> vector<64x32xf32>
    %57 = arith.addf %48, %56 : vector<64x32xf32>
    %58 = vector.extract_strided_slice %22 {offsets = [16, 0], sizes = [64, 4], strides = [1, 1]} : vector<96x4xbf16> to vector<64x4xbf16>
    %c4 = arith.constant 4 : index
    %c0_25 = arith.constant 0 : index
    %c0_26 = arith.constant 0 : index
    %59 = vector.load %arg3[%c4, %c0_25, %c0_26] : memref<9x4x32xbf16, #tpu.memory_space<vmem>>, vector<1x4x32xbf16>
    %60 = vector.shape_cast %59 : vector<1x4x32xbf16> to vector<4x32xbf16>
    %cst_27 = arith.constant dense<0.000000e+00> : vector<64x32xf32>
    %61 = tpu.matmul %58, %60, %cst_27 {dimension_numbers = #tpu.dot_dimension_numbers<[1], [0], [0], [1], [0, 0, 1, 1], [], []>} : vector<64x4xbf16>, vector<4x32xbf16>, vector<64x32xf32> -> vector<64x32xf32>
    %62 = arith.addf %57, %61 : vector<64x32xf32>
    %63 = vector.extract_strided_slice %22 {offsets = [17, 0], sizes = [64, 4], strides = [1, 1]} : vector<96x4xbf16> to vector<64x4xbf16>
    %cst_28 = arith.constant 0.000000e+00 : bf16
    %64 = vector.shape_cast %20 : vector<64x1xi1> to vector<64x1xi1>
    %65 = vector.broadcast %64 : vector<64x1xi1> to vector<64x4xi1>
    %66 = vector.broadcast %cst_28 : bf16 to vector<64x4xbf16>
    %67 = arith.select %65, %63, %66 : vector<64x4xi1>, vector<64x4xbf16>
    %c5 = arith.constant 5 : index
    %c0_29 = arith.constant 0 : index
    %c0_30 = arith.constant 0 : index
    %68 = vector.load %arg3[%c5, %c0_29, %c0_30] : memref<9x4x32xbf16, #tpu.memory_space<vmem>>, vector<1x4x32xbf16>
    %69 = vector.shape_cast %68 : vector<1x4x32xbf16> to vector<4x32xbf16>
    %cst_31 = arith.constant dense<0.000000e+00> : vector<64x32xf32>
    %70 = tpu.matmul %67, %69, %cst_31 {dimension_numbers = #tpu.dot_dimension_numbers<[1], [0], [0], [1], [0, 0, 1, 1], [], []>} : vector<64x4xbf16>, vector<4x32xbf16>, vector<64x32xf32> -> vector<64x32xf32>
    %71 = arith.addf %62, %70 : vector<64x32xf32>
    %72 = vector.extract_strided_slice %22 {offsets = [23, 0], sizes = [64, 4], strides = [1, 1]} : vector<96x4xbf16> to vector<64x4xbf16>
    %cst_32 = arith.constant 0.000000e+00 : bf16
    %73 = vector.shape_cast %18 : vector<64x1xi1> to vector<64x1xi1>
    %74 = vector.broadcast %73 : vector<64x1xi1> to vector<64x4xi1>
    %75 = vector.broadcast %cst_32 : bf16 to vector<64x4xbf16>
    %76 = arith.select %74, %72, %75 : vector<64x4xi1>, vector<64x4xbf16>
    %c6 = arith.constant 6 : index
    %c0_33 = arith.constant 0 : index
    %c0_34 = arith.constant 0 : index
    %77 = vector.load %arg3[%c6, %c0_33, %c0_34] : memref<9x4x32xbf16, #tpu.memory_space<vmem>>, vector<1x4x32xbf16>
    %78 = vector.shape_cast %77 : vector<1x4x32xbf16> to vector<4x32xbf16>
    %cst_35 = arith.constant dense<0.000000e+00> : vector<64x32xf32>
    %79 = tpu.matmul %76, %78, %cst_35 {dimension_numbers = #tpu.dot_dimension_numbers<[1], [0], [0], [1], [0, 0, 1, 1], [], []>} : vector<64x4xbf16>, vector<4x32xbf16>, vector<64x32xf32> -> vector<64x32xf32>
    %80 = arith.addf %71, %79 : vector<64x32xf32>
    %81 = vector.extract_strided_slice %22 {offsets = [24, 0], sizes = [64, 4], strides = [1, 1]} : vector<96x4xbf16> to vector<64x4xbf16>
    %c7 = arith.constant 7 : index
    %c0_36 = arith.constant 0 : index
    %c0_37 = arith.constant 0 : index
    %82 = vector.load %arg3[%c7, %c0_36, %c0_37] : memref<9x4x32xbf16, #tpu.memory_space<vmem>>, vector<1x4x32xbf16>
    %83 = vector.shape_cast %82 : vector<1x4x32xbf16> to vector<4x32xbf16>
    %cst_38 = arith.constant dense<0.000000e+00> : vector<64x32xf32>
    %84 = tpu.matmul %81, %83, %cst_38 {dimension_numbers = #tpu.dot_dimension_numbers<[1], [0], [0], [1], [0, 0, 1, 1], [], []>} : vector<64x4xbf16>, vector<4x32xbf16>, vector<64x32xf32> -> vector<64x32xf32>
    %85 = arith.addf %80, %84 : vector<64x32xf32>
    %86 = vector.extract_strided_slice %22 {offsets = [25, 0], sizes = [64, 4], strides = [1, 1]} : vector<96x4xbf16> to vector<64x4xbf16>
    %cst_39 = arith.constant 0.000000e+00 : bf16
    %87 = vector.shape_cast %20 : vector<64x1xi1> to vector<64x1xi1>
    %88 = vector.broadcast %87 : vector<64x1xi1> to vector<64x4xi1>
    %89 = vector.broadcast %cst_39 : bf16 to vector<64x4xbf16>
    %90 = arith.select %88, %86, %89 : vector<64x4xi1>, vector<64x4xbf16>
    %c8 = arith.constant 8 : index
    %c0_40 = arith.constant 0 : index
    %c0_41 = arith.constant 0 : index
    %91 = vector.load %arg3[%c8, %c0_40, %c0_41] : memref<9x4x32xbf16, #tpu.memory_space<vmem>>, vector<1x4x32xbf16>
    %92 = vector.shape_cast %91 : vector<1x4x32xbf16> to vector<4x32xbf16>
    %cst_42 = arith.constant dense<0.000000e+00> : vector<64x32xf32>
    %93 = tpu.matmul %90, %92, %cst_42 {dimension_numbers = #tpu.dot_dimension_numbers<[1], [0], [0], [1], [0, 0, 1, 1], [], []>} : vector<64x4xbf16>, vector<4x32xbf16>, vector<64x32xf32> -> vector<64x32xf32>
    %94 = arith.addf %85, %93 : vector<64x32xf32>
    %c0_43 = arith.constant 0 : index
    %c0_44 = arith.constant 0 : index
    %95 = vector.load %arg4[%c0_43, %c0_44] : memref<1x32xf32, #tpu.memory_space<vmem>>, vector<1x32xf32>
    %96 = vector.broadcast %95 : vector<1x32xf32> to vector<64x32xf32>
    %97 = arith.addf %94, %96 : vector<64x32xf32>
    %cst_45 = arith.constant 0.000000e+00 : f32
    %98 = vector.broadcast %cst_45 : f32 to vector<64x32xf32>
    %99 = arith.maximumf %97, %98 : vector<64x32xf32>
    %100 = arith.truncf %99 : vector<64x32xf32> to vector<64x32xbf16>
    %cst_46 = arith.constant 0.000000e+00 : bf16
    %101 = vector.broadcast %cst_46 : bf16 to vector<16x32xbf16>
    %102 = tpu.concatenate %101, %100, %101 in 0 : vector<16x32xbf16>, vector<64x32xbf16>, vector<16x32xbf16> -> vector<96x32xbf16>
    %cst_47 = arith.constant 0.000000e+00 : f32
    %103 = vector.broadcast %cst_47 : f32 to vector<64x32xf32>
    %104 = vector.extract_strided_slice %24 {offsets = [7, 0], sizes = [64, 32], strides = [1, 1]} : vector<96x32xbf16> to vector<64x32xbf16>
    %cst_48 = arith.constant 0.000000e+00 : bf16
    %105 = vector.shape_cast %18 : vector<64x1xi1> to vector<64x1xi1>
    %106 = vector.broadcast %105 : vector<64x1xi1> to vector<64x32xi1>
    %107 = vector.broadcast %cst_48 : bf16 to vector<64x32xbf16>
    %108 = arith.select %106, %104, %107 : vector<64x32xi1>, vector<64x32xbf16>
    %c0_49 = arith.constant 0 : index
    %c0_50 = arith.constant 0 : index
    %c0_51 = arith.constant 0 : index
    %109 = vector.load %arg5[%c0_49, %c0_50, %c0_51] : memref<9x32x32xbf16, #tpu.memory_space<vmem>>, vector<1x32x32xbf16>
    %110 = vector.shape_cast %109 : vector<1x32x32xbf16> to vector<32x32xbf16>
    %cst_52 = arith.constant dense<0.000000e+00> : vector<64x32xf32>
    %111 = tpu.matmul %108, %110, %cst_52 {dimension_numbers = #tpu.dot_dimension_numbers<[1], [0], [0], [1], [0, 0, 1, 1], [], []>} : vector<64x32xbf16>, vector<32x32xbf16>, vector<64x32xf32> -> vector<64x32xf32>
    %112 = arith.addf %103, %111 : vector<64x32xf32>
    %113 = vector.extract_strided_slice %24 {offsets = [8, 0], sizes = [64, 32], strides = [1, 1]} : vector<96x32xbf16> to vector<64x32xbf16>
    %c1_53 = arith.constant 1 : index
    %c0_54 = arith.constant 0 : index
    %c0_55 = arith.constant 0 : index
    %114 = vector.load %arg5[%c1_53, %c0_54, %c0_55] : memref<9x32x32xbf16, #tpu.memory_space<vmem>>, vector<1x32x32xbf16>
    %115 = vector.shape_cast %114 : vector<1x32x32xbf16> to vector<32x32xbf16>
    %cst_56 = arith.constant dense<0.000000e+00> : vector<64x32xf32>
    %116 = tpu.matmul %113, %115, %cst_56 {dimension_numbers = #tpu.dot_dimension_numbers<[1], [0], [0], [1], [0, 0, 1, 1], [], []>} : vector<64x32xbf16>, vector<32x32xbf16>, vector<64x32xf32> -> vector<64x32xf32>
    %117 = arith.addf %112, %116 : vector<64x32xf32>
    %118 = vector.extract_strided_slice %24 {offsets = [9, 0], sizes = [64, 32], strides = [1, 1]} : vector<96x32xbf16> to vector<64x32xbf16>
    %cst_57 = arith.constant 0.000000e+00 : bf16
    %119 = vector.shape_cast %20 : vector<64x1xi1> to vector<64x1xi1>
    %120 = vector.broadcast %119 : vector<64x1xi1> to vector<64x32xi1>
    %121 = vector.broadcast %cst_57 : bf16 to vector<64x32xbf16>
    %122 = arith.select %120, %118, %121 : vector<64x32xi1>, vector<64x32xbf16>
    %c2_58 = arith.constant 2 : index
    %c0_59 = arith.constant 0 : index
    %c0_60 = arith.constant 0 : index
    %123 = vector.load %arg5[%c2_58, %c0_59, %c0_60] : memref<9x32x32xbf16, #tpu.memory_space<vmem>>, vector<1x32x32xbf16>
    %124 = vector.shape_cast %123 : vector<1x32x32xbf16> to vector<32x32xbf16>
    %cst_61 = arith.constant dense<0.000000e+00> : vector<64x32xf32>
    %125 = tpu.matmul %122, %124, %cst_61 {dimension_numbers = #tpu.dot_dimension_numbers<[1], [0], [0], [1], [0, 0, 1, 1], [], []>} : vector<64x32xbf16>, vector<32x32xbf16>, vector<64x32xf32> -> vector<64x32xf32>
    %126 = arith.addf %117, %125 : vector<64x32xf32>
    %127 = vector.extract_strided_slice %24 {offsets = [15, 0], sizes = [64, 32], strides = [1, 1]} : vector<96x32xbf16> to vector<64x32xbf16>
    %cst_62 = arith.constant 0.000000e+00 : bf16
    %128 = vector.shape_cast %18 : vector<64x1xi1> to vector<64x1xi1>
    %129 = vector.broadcast %128 : vector<64x1xi1> to vector<64x32xi1>
    %130 = vector.broadcast %cst_62 : bf16 to vector<64x32xbf16>
    %131 = arith.select %129, %127, %130 : vector<64x32xi1>, vector<64x32xbf16>
    %c3_63 = arith.constant 3 : index
    %c0_64 = arith.constant 0 : index
    %c0_65 = arith.constant 0 : index
    %132 = vector.load %arg5[%c3_63, %c0_64, %c0_65] : memref<9x32x32xbf16, #tpu.memory_space<vmem>>, vector<1x32x32xbf16>
    %133 = vector.shape_cast %132 : vector<1x32x32xbf16> to vector<32x32xbf16>
    %cst_66 = arith.constant dense<0.000000e+00> : vector<64x32xf32>
    %134 = tpu.matmul %131, %133, %cst_66 {dimension_numbers = #tpu.dot_dimension_numbers<[1], [0], [0], [1], [0, 0, 1, 1], [], []>} : vector<64x32xbf16>, vector<32x32xbf16>, vector<64x32xf32> -> vector<64x32xf32>
    %135 = arith.addf %126, %134 : vector<64x32xf32>
    %136 = vector.extract_strided_slice %24 {offsets = [16, 0], sizes = [64, 32], strides = [1, 1]} : vector<96x32xbf16> to vector<64x32xbf16>
    %c4_67 = arith.constant 4 : index
    %c0_68 = arith.constant 0 : index
    %c0_69 = arith.constant 0 : index
    %137 = vector.load %arg5[%c4_67, %c0_68, %c0_69] : memref<9x32x32xbf16, #tpu.memory_space<vmem>>, vector<1x32x32xbf16>
    %138 = vector.shape_cast %137 : vector<1x32x32xbf16> to vector<32x32xbf16>
    %cst_70 = arith.constant dense<0.000000e+00> : vector<64x32xf32>
    %139 = tpu.matmul %136, %138, %cst_70 {dimension_numbers = #tpu.dot_dimension_numbers<[1], [0], [0], [1], [0, 0, 1, 1], [], []>} : vector<64x32xbf16>, vector<32x32xbf16>, vector<64x32xf32> -> vector<64x32xf32>
    %140 = arith.addf %135, %139 : vector<64x32xf32>
    %141 = vector.extract_strided_slice %24 {offsets = [17, 0], sizes = [64, 32], strides = [1, 1]} : vector<96x32xbf16> to vector<64x32xbf16>
    %cst_71 = arith.constant 0.000000e+00 : bf16
    %142 = vector.shape_cast %20 : vector<64x1xi1> to vector<64x1xi1>
    %143 = vector.broadcast %142 : vector<64x1xi1> to vector<64x32xi1>
    %144 = vector.broadcast %cst_71 : bf16 to vector<64x32xbf16>
    %145 = arith.select %143, %141, %144 : vector<64x32xi1>, vector<64x32xbf16>
    %c5_72 = arith.constant 5 : index
    %c0_73 = arith.constant 0 : index
    %c0_74 = arith.constant 0 : index
    %146 = vector.load %arg5[%c5_72, %c0_73, %c0_74] : memref<9x32x32xbf16, #tpu.memory_space<vmem>>, vector<1x32x32xbf16>
    %147 = vector.shape_cast %146 : vector<1x32x32xbf16> to vector<32x32xbf16>
    %cst_75 = arith.constant dense<0.000000e+00> : vector<64x32xf32>
    %148 = tpu.matmul %145, %147, %cst_75 {dimension_numbers = #tpu.dot_dimension_numbers<[1], [0], [0], [1], [0, 0, 1, 1], [], []>} : vector<64x32xbf16>, vector<32x32xbf16>, vector<64x32xf32> -> vector<64x32xf32>
    %149 = arith.addf %140, %148 : vector<64x32xf32>
    %150 = vector.extract_strided_slice %24 {offsets = [23, 0], sizes = [64, 32], strides = [1, 1]} : vector<96x32xbf16> to vector<64x32xbf16>
    %cst_76 = arith.constant 0.000000e+00 : bf16
    %151 = vector.shape_cast %18 : vector<64x1xi1> to vector<64x1xi1>
    %152 = vector.broadcast %151 : vector<64x1xi1> to vector<64x32xi1>
    %153 = vector.broadcast %cst_76 : bf16 to vector<64x32xbf16>
    %154 = arith.select %152, %150, %153 : vector<64x32xi1>, vector<64x32xbf16>
    %c6_77 = arith.constant 6 : index
    %c0_78 = arith.constant 0 : index
    %c0_79 = arith.constant 0 : index
    %155 = vector.load %arg5[%c6_77, %c0_78, %c0_79] : memref<9x32x32xbf16, #tpu.memory_space<vmem>>, vector<1x32x32xbf16>
    %156 = vector.shape_cast %155 : vector<1x32x32xbf16> to vector<32x32xbf16>
    %cst_80 = arith.constant dense<0.000000e+00> : vector<64x32xf32>
    %157 = tpu.matmul %154, %156, %cst_80 {dimension_numbers = #tpu.dot_dimension_numbers<[1], [0], [0], [1], [0, 0, 1, 1], [], []>} : vector<64x32xbf16>, vector<32x32xbf16>, vector<64x32xf32> -> vector<64x32xf32>
    %158 = arith.addf %149, %157 : vector<64x32xf32>
    %159 = vector.extract_strided_slice %24 {offsets = [24, 0], sizes = [64, 32], strides = [1, 1]} : vector<96x32xbf16> to vector<64x32xbf16>
    %c7_81 = arith.constant 7 : index
    %c0_82 = arith.constant 0 : index
    %c0_83 = arith.constant 0 : index
    %160 = vector.load %arg5[%c7_81, %c0_82, %c0_83] : memref<9x32x32xbf16, #tpu.memory_space<vmem>>, vector<1x32x32xbf16>
    %161 = vector.shape_cast %160 : vector<1x32x32xbf16> to vector<32x32xbf16>
    %cst_84 = arith.constant dense<0.000000e+00> : vector<64x32xf32>
    %162 = tpu.matmul %159, %161, %cst_84 {dimension_numbers = #tpu.dot_dimension_numbers<[1], [0], [0], [1], [0, 0, 1, 1], [], []>} : vector<64x32xbf16>, vector<32x32xbf16>, vector<64x32xf32> -> vector<64x32xf32>
    %163 = arith.addf %158, %162 : vector<64x32xf32>
    %164 = vector.extract_strided_slice %24 {offsets = [25, 0], sizes = [64, 32], strides = [1, 1]} : vector<96x32xbf16> to vector<64x32xbf16>
    %cst_85 = arith.constant 0.000000e+00 : bf16
    %165 = vector.shape_cast %20 : vector<64x1xi1> to vector<64x1xi1>
    %166 = vector.broadcast %165 : vector<64x1xi1> to vector<64x32xi1>
    %167 = vector.broadcast %cst_85 : bf16 to vector<64x32xbf16>
    %168 = arith.select %166, %164, %167 : vector<64x32xi1>, vector<64x32xbf16>
    %c8_86 = arith.constant 8 : index
    %c0_87 = arith.constant 0 : index
    %c0_88 = arith.constant 0 : index
    %169 = vector.load %arg5[%c8_86, %c0_87, %c0_88] : memref<9x32x32xbf16, #tpu.memory_space<vmem>>, vector<1x32x32xbf16>
    %170 = vector.shape_cast %169 : vector<1x32x32xbf16> to vector<32x32xbf16>
    %cst_89 = arith.constant dense<0.000000e+00> : vector<64x32xf32>
    %171 = tpu.matmul %168, %170, %cst_89 {dimension_numbers = #tpu.dot_dimension_numbers<[1], [0], [0], [1], [0, 0, 1, 1], [], []>} : vector<64x32xbf16>, vector<32x32xbf16>, vector<64x32xf32> -> vector<64x32xf32>
    %172 = arith.addf %163, %171 : vector<64x32xf32>
    %173 = vector.extract_strided_slice %102 {offsets = [7, 0], sizes = [64, 32], strides = [1, 1]} : vector<96x32xbf16> to vector<64x32xbf16>
    %cst_90 = arith.constant 0.000000e+00 : bf16
    %174 = vector.shape_cast %18 : vector<64x1xi1> to vector<64x1xi1>
    %175 = vector.broadcast %174 : vector<64x1xi1> to vector<64x32xi1>
    %176 = vector.broadcast %cst_90 : bf16 to vector<64x32xbf16>
    %177 = arith.select %175, %173, %176 : vector<64x32xi1>, vector<64x32xbf16>
    %c0_91 = arith.constant 0 : index
    %c0_92 = arith.constant 0 : index
    %c0_93 = arith.constant 0 : index
    %178 = vector.load %arg6[%c0_91, %c0_92, %c0_93] : memref<9x32x32xbf16, #tpu.memory_space<vmem>>, vector<1x32x32xbf16>
    %179 = vector.shape_cast %178 : vector<1x32x32xbf16> to vector<32x32xbf16>
    %cst_94 = arith.constant dense<0.000000e+00> : vector<64x32xf32>
    %180 = tpu.matmul %177, %179, %cst_94 {dimension_numbers = #tpu.dot_dimension_numbers<[1], [0], [0], [1], [0, 0, 1, 1], [], []>} : vector<64x32xbf16>, vector<32x32xbf16>, vector<64x32xf32> -> vector<64x32xf32>
    %181 = arith.addf %172, %180 : vector<64x32xf32>
    %182 = vector.extract_strided_slice %102 {offsets = [8, 0], sizes = [64, 32], strides = [1, 1]} : vector<96x32xbf16> to vector<64x32xbf16>
    %c1_95 = arith.constant 1 : index
    %c0_96 = arith.constant 0 : index
    %c0_97 = arith.constant 0 : index
    %183 = vector.load %arg6[%c1_95, %c0_96, %c0_97] : memref<9x32x32xbf16, #tpu.memory_space<vmem>>, vector<1x32x32xbf16>
    %184 = vector.shape_cast %183 : vector<1x32x32xbf16> to vector<32x32xbf16>
    %cst_98 = arith.constant dense<0.000000e+00> : vector<64x32xf32>
    %185 = tpu.matmul %182, %184, %cst_98 {dimension_numbers = #tpu.dot_dimension_numbers<[1], [0], [0], [1], [0, 0, 1, 1], [], []>} : vector<64x32xbf16>, vector<32x32xbf16>, vector<64x32xf32> -> vector<64x32xf32>
    %186 = arith.addf %181, %185 : vector<64x32xf32>
    %187 = vector.extract_strided_slice %102 {offsets = [9, 0], sizes = [64, 32], strides = [1, 1]} : vector<96x32xbf16> to vector<64x32xbf16>
    %cst_99 = arith.constant 0.000000e+00 : bf16
    %188 = vector.shape_cast %20 : vector<64x1xi1> to vector<64x1xi1>
    %189 = vector.broadcast %188 : vector<64x1xi1> to vector<64x32xi1>
    %190 = vector.broadcast %cst_99 : bf16 to vector<64x32xbf16>
    %191 = arith.select %189, %187, %190 : vector<64x32xi1>, vector<64x32xbf16>
    %c2_100 = arith.constant 2 : index
    %c0_101 = arith.constant 0 : index
    %c0_102 = arith.constant 0 : index
    %192 = vector.load %arg6[%c2_100, %c0_101, %c0_102] : memref<9x32x32xbf16, #tpu.memory_space<vmem>>, vector<1x32x32xbf16>
    %193 = vector.shape_cast %192 : vector<1x32x32xbf16> to vector<32x32xbf16>
    %cst_103 = arith.constant dense<0.000000e+00> : vector<64x32xf32>
    %194 = tpu.matmul %191, %193, %cst_103 {dimension_numbers = #tpu.dot_dimension_numbers<[1], [0], [0], [1], [0, 0, 1, 1], [], []>} : vector<64x32xbf16>, vector<32x32xbf16>, vector<64x32xf32> -> vector<64x32xf32>
    %195 = arith.addf %186, %194 : vector<64x32xf32>
    %196 = vector.extract_strided_slice %102 {offsets = [15, 0], sizes = [64, 32], strides = [1, 1]} : vector<96x32xbf16> to vector<64x32xbf16>
    %cst_104 = arith.constant 0.000000e+00 : bf16
    %197 = vector.shape_cast %18 : vector<64x1xi1> to vector<64x1xi1>
    %198 = vector.broadcast %197 : vector<64x1xi1> to vector<64x32xi1>
    %199 = vector.broadcast %cst_104 : bf16 to vector<64x32xbf16>
    %200 = arith.select %198, %196, %199 : vector<64x32xi1>, vector<64x32xbf16>
    %c3_105 = arith.constant 3 : index
    %c0_106 = arith.constant 0 : index
    %c0_107 = arith.constant 0 : index
    %201 = vector.load %arg6[%c3_105, %c0_106, %c0_107] : memref<9x32x32xbf16, #tpu.memory_space<vmem>>, vector<1x32x32xbf16>
    %202 = vector.shape_cast %201 : vector<1x32x32xbf16> to vector<32x32xbf16>
    %cst_108 = arith.constant dense<0.000000e+00> : vector<64x32xf32>
    %203 = tpu.matmul %200, %202, %cst_108 {dimension_numbers = #tpu.dot_dimension_numbers<[1], [0], [0], [1], [0, 0, 1, 1], [], []>} : vector<64x32xbf16>, vector<32x32xbf16>, vector<64x32xf32> -> vector<64x32xf32>
    %204 = arith.addf %195, %203 : vector<64x32xf32>
    %205 = vector.extract_strided_slice %102 {offsets = [16, 0], sizes = [64, 32], strides = [1, 1]} : vector<96x32xbf16> to vector<64x32xbf16>
    %c4_109 = arith.constant 4 : index
    %c0_110 = arith.constant 0 : index
    %c0_111 = arith.constant 0 : index
    %206 = vector.load %arg6[%c4_109, %c0_110, %c0_111] : memref<9x32x32xbf16, #tpu.memory_space<vmem>>, vector<1x32x32xbf16>
    %207 = vector.shape_cast %206 : vector<1x32x32xbf16> to vector<32x32xbf16>
    %cst_112 = arith.constant dense<0.000000e+00> : vector<64x32xf32>
    %208 = tpu.matmul %205, %207, %cst_112 {dimension_numbers = #tpu.dot_dimension_numbers<[1], [0], [0], [1], [0, 0, 1, 1], [], []>} : vector<64x32xbf16>, vector<32x32xbf16>, vector<64x32xf32> -> vector<64x32xf32>
    %209 = arith.addf %204, %208 : vector<64x32xf32>
    %210 = vector.extract_strided_slice %102 {offsets = [17, 0], sizes = [64, 32], strides = [1, 1]} : vector<96x32xbf16> to vector<64x32xbf16>
    %cst_113 = arith.constant 0.000000e+00 : bf16
    %211 = vector.shape_cast %20 : vector<64x1xi1> to vector<64x1xi1>
    %212 = vector.broadcast %211 : vector<64x1xi1> to vector<64x32xi1>
    %213 = vector.broadcast %cst_113 : bf16 to vector<64x32xbf16>
    %214 = arith.select %212, %210, %213 : vector<64x32xi1>, vector<64x32xbf16>
    %c5_114 = arith.constant 5 : index
    %c0_115 = arith.constant 0 : index
    %c0_116 = arith.constant 0 : index
    %215 = vector.load %arg6[%c5_114, %c0_115, %c0_116] : memref<9x32x32xbf16, #tpu.memory_space<vmem>>, vector<1x32x32xbf16>
    %216 = vector.shape_cast %215 : vector<1x32x32xbf16> to vector<32x32xbf16>
    %cst_117 = arith.constant dense<0.000000e+00> : vector<64x32xf32>
    %217 = tpu.matmul %214, %216, %cst_117 {dimension_numbers = #tpu.dot_dimension_numbers<[1], [0], [0], [1], [0, 0, 1, 1], [], []>} : vector<64x32xbf16>, vector<32x32xbf16>, vector<64x32xf32> -> vector<64x32xf32>
    %218 = arith.addf %209, %217 : vector<64x32xf32>
    %219 = vector.extract_strided_slice %102 {offsets = [23, 0], sizes = [64, 32], strides = [1, 1]} : vector<96x32xbf16> to vector<64x32xbf16>
    %cst_118 = arith.constant 0.000000e+00 : bf16
    %220 = vector.shape_cast %18 : vector<64x1xi1> to vector<64x1xi1>
    %221 = vector.broadcast %220 : vector<64x1xi1> to vector<64x32xi1>
    %222 = vector.broadcast %cst_118 : bf16 to vector<64x32xbf16>
    %223 = arith.select %221, %219, %222 : vector<64x32xi1>, vector<64x32xbf16>
    %c6_119 = arith.constant 6 : index
    %c0_120 = arith.constant 0 : index
    %c0_121 = arith.constant 0 : index
    %224 = vector.load %arg6[%c6_119, %c0_120, %c0_121] : memref<9x32x32xbf16, #tpu.memory_space<vmem>>, vector<1x32x32xbf16>
    %225 = vector.shape_cast %224 : vector<1x32x32xbf16> to vector<32x32xbf16>
    %cst_122 = arith.constant dense<0.000000e+00> : vector<64x32xf32>
    %226 = tpu.matmul %223, %225, %cst_122 {dimension_numbers = #tpu.dot_dimension_numbers<[1], [0], [0], [1], [0, 0, 1, 1], [], []>} : vector<64x32xbf16>, vector<32x32xbf16>, vector<64x32xf32> -> vector<64x32xf32>
    %227 = arith.addf %218, %226 : vector<64x32xf32>
    %228 = vector.extract_strided_slice %102 {offsets = [24, 0], sizes = [64, 32], strides = [1, 1]} : vector<96x32xbf16> to vector<64x32xbf16>
    %c7_123 = arith.constant 7 : index
    %c0_124 = arith.constant 0 : index
    %c0_125 = arith.constant 0 : index
    %229 = vector.load %arg6[%c7_123, %c0_124, %c0_125] : memref<9x32x32xbf16, #tpu.memory_space<vmem>>, vector<1x32x32xbf16>
    %230 = vector.shape_cast %229 : vector<1x32x32xbf16> to vector<32x32xbf16>
    %cst_126 = arith.constant dense<0.000000e+00> : vector<64x32xf32>
    %231 = tpu.matmul %228, %230, %cst_126 {dimension_numbers = #tpu.dot_dimension_numbers<[1], [0], [0], [1], [0, 0, 1, 1], [], []>} : vector<64x32xbf16>, vector<32x32xbf16>, vector<64x32xf32> -> vector<64x32xf32>
    %232 = arith.addf %227, %231 : vector<64x32xf32>
    %233 = vector.extract_strided_slice %102 {offsets = [25, 0], sizes = [64, 32], strides = [1, 1]} : vector<96x32xbf16> to vector<64x32xbf16>
    %cst_127 = arith.constant 0.000000e+00 : bf16
    %234 = vector.shape_cast %20 : vector<64x1xi1> to vector<64x1xi1>
    %235 = vector.broadcast %234 : vector<64x1xi1> to vector<64x32xi1>
    %236 = vector.broadcast %cst_127 : bf16 to vector<64x32xbf16>
    %237 = arith.select %235, %233, %236 : vector<64x32xi1>, vector<64x32xbf16>
    %c8_128 = arith.constant 8 : index
    %c0_129 = arith.constant 0 : index
    %c0_130 = arith.constant 0 : index
    %238 = vector.load %arg6[%c8_128, %c0_129, %c0_130] : memref<9x32x32xbf16, #tpu.memory_space<vmem>>, vector<1x32x32xbf16>
    %239 = vector.shape_cast %238 : vector<1x32x32xbf16> to vector<32x32xbf16>
    %cst_131 = arith.constant dense<0.000000e+00> : vector<64x32xf32>
    %240 = tpu.matmul %237, %239, %cst_131 {dimension_numbers = #tpu.dot_dimension_numbers<[1], [0], [0], [1], [0, 0, 1, 1], [], []>} : vector<64x32xbf16>, vector<32x32xbf16>, vector<64x32xf32> -> vector<64x32xf32>
    %241 = arith.addf %232, %240 : vector<64x32xf32>
    %c0_132 = arith.constant 0 : index
    %c0_133 = arith.constant 0 : index
    %242 = vector.load %arg7[%c0_132, %c0_133] : memref<1x32xf32, #tpu.memory_space<vmem>>, vector<1x32xf32>
    %243 = vector.broadcast %242 : vector<1x32xf32> to vector<64x32xf32>
    %244 = arith.addf %241, %243 : vector<64x32xf32>
    %cst_134 = arith.constant 0.000000e+00 : f32
    %245 = vector.broadcast %cst_134 : f32 to vector<64x32xf32>
    %246 = arith.maximumf %244, %245 : vector<64x32xf32>
    %c0_135 = arith.constant 0 : index
    %c0_136 = arith.constant 0 : index
    %c0_137 = arith.constant 0 : index
    %247 = vector.load %arg8[%c0_135, %c0_136, %c0_137] : memref<1x64x32xf32, #tpu.memory_space<vmem>>, vector<1x64x32xf32>
    %248 = vector.shape_cast %247 : vector<1x64x32xf32> to vector<64x32xf32>
    %249 = vector.shape_cast %246 : vector<64x32xf32> to vector<1x64x32xf32>
    tpu.vector_store %arg8[%c0_135, %c0_136, %c0_137], %249 {strides = array<i32>} : memref<1x64x32xf32, #tpu.memory_space<vmem>>, vector<1x64x32xf32>,
    return
  }
  func.func @transform_0(%arg0: i32) -> (i32, i32, i32) {
    %c0_i32 = arith.constant 0 : i32
    %c0_i32_0 = arith.constant 0 : i32
    %c0_i32_1 = arith.constant 0 : i32
    return %arg0, %c0_i32, %c0_i32_0 : i32, i32, i32
  }
  func.func @transform_1(%arg0: i32) -> (i32, i32, i32) {
    %c0_i32 = arith.constant 0 : i32
    %c0_i32_0 = arith.constant 0 : i32
    %c0_i32_1 = arith.constant 0 : i32
    return %arg0, %c0_i32, %c0_i32_0 : i32, i32, i32
  }
  func.func @transform_2(%arg0: i32) -> (i32, i32, i32) {
    %c0_i32 = arith.constant 0 : i32
    %c0_i32_0 = arith.constant 0 : i32
    %c0_i32_1 = arith.constant 0 : i32
    %c0_i32_2 = arith.constant 0 : i32
    return %c0_i32, %c0_i32_0, %c0_i32_1 : i32, i32, i32
  }
  func.func @transform_3(%arg0: i32) -> (i32, i32) {
    %c0_i32 = arith.constant 0 : i32
    %c0_i32_0 = arith.constant 0 : i32
    %c0_i32_1 = arith.constant 0 : i32
    return %c0_i32, %c0_i32_0 : i32, i32
  }
  func.func @transform_4(%arg0: i32) -> (i32, i32, i32) {
    %c0_i32 = arith.constant 0 : i32
    %c0_i32_0 = arith.constant 0 : i32
    %c0_i32_1 = arith.constant 0 : i32
    %c0_i32_2 = arith.constant 0 : i32
    return %c0_i32, %c0_i32_0, %c0_i32_1 : i32, i32, i32
  }
  func.func @transform_5(%arg0: i32) -> (i32, i32, i32) {
    %c0_i32 = arith.constant 0 : i32
    %c0_i32_0 = arith.constant 0 : i32
    %c0_i32_1 = arith.constant 0 : i32
    %c0_i32_2 = arith.constant 0 : i32
    return %c0_i32, %c0_i32_0, %c0_i32_1 : i32, i32, i32
  }
  func.func @transform_6(%arg0: i32) -> (i32, i32) {
    %c0_i32 = arith.constant 0 : i32
    %c0_i32_0 = arith.constant 0 : i32
    %c0_i32_1 = arith.constant 0 : i32
    return %c0_i32, %c0_i32_0 : i32, i32
  }
  func.func @transform_7(%arg0: i32) -> (i32, i32, i32) {
    %c0_i32 = arith.constant 0 : i32
    %c0_i32_0 = arith.constant 0 : i32
    %c0_i32_1 = arith.constant 0 : i32
    return %arg0, %c0_i32, %c0_i32_0 : i32, i32, i32
  }
}

</mosaic_0001>

<bundles_post_ra>
// kernel: tile.13
= control target key start
LH: loop header
LB: loop body
LE: loop exit
PB: predicated region body
PF: predicated region fallthrough
CT: control target
= control target key end

     0   :  { %s22_s0 = inlined_call_operand.vmem [shape: f32[8], index: 0, kind: input, shape index: {}]   ;;  %s23_s1 = inlined_call_operand.vmem [shape: f32[4,8], index: 1, kind: output, shape index: {}]  }
   0x1   :  { %v4_v0 = vld [vmem:[%s22_s0] ss:$0 sm:$0xff] }
   0x2   :  { %5 = vst [vmem:[%s23_s1] sm:$0xf] %v4_v0 }

// kernel: tile.14
= control target key start
LH: loop header
LB: loop body
LE: loop exit
PB: predicated region body
PF: predicated region fallthrough
CT: control target
= control target key end

     0   :  { %vm7_vm0 = vcmask 64512   ;;  %s37_s8 = smov 8   ;;  %s38_s9 = smov 16   ;;  %vm13_vm1 = vcmask 261312   ;;  %vm19_vm2 = vcmask 195712   ;;  %vm25_vm3 = vcmask 130112   ;;  %s55_s0 = inlined_call_operand.vmem [shape: f32[4,8], index: 0, kind: input, shape index: {}]   ;;  %s56_s1 = inlined_call_operand.vmem [shape: f32[1,32], index: 1, kind: output, shape index: {}]  }
   0x1   :  { %v4_v0 = vld [vmem:[%s55_s0] sm:$0xf]  ;;  %s36_s0 = smov 24  }
   0x2   :  { %5 = vst [vmem:[#allocation1] sm:$0xf] %v4_v0 }
   0x9   :  { %v10_v1 = vld [vmem:[#allocation1 + $0x3] sm:$0x1]   ;;  %v22_v2 = vld [vmem:[#allocation1 + $0x1] sm:$0x1]   ;;  %v6_v3 = vld [vmem:[#allocation1] sm:$0x1]  }
   0xa   :  { %11 = vrot.lane.b32.xlu0 %v10_v1, %s36_s0  ;;  %23 = vrot.lane.b32.xlu1 %v22_v2, %s37_s8  ;;  %v16_v4 = vld [vmem:[#allocation1 + $0x2] sm:$0x1]   ;;  %8 = vst.msk [vmem:[#allocation0] sm:$0x1] %vm7_vm0, %v6_v3  }
   0xe   :  { %17 = vrot.lane.b32.xlu0 %v16_v4, %s38_s9 }
  0x7c   :  { %v12_v5 = vpop.permute.xlu0 %11   ;;  %v24_v6 = vpop.permute.xlu1 %23  }
  0x7d   :  { %14 = vst.msk [vmem:[#allocation0] sm:$0x1] %vm13_vm1, %v12_v5  }
  0x80   :  { %v18_v7 = vpop.permute.xlu0 %17  }
  0x81   :  { %20 = vst.msk [vmem:[#allocation0] sm:$0x1] %vm19_vm2, %v18_v7  }
  0x82   :  { %26 = vst.msk [vmem:[#allocation0] sm:$0x1] %vm25_vm3, %v24_v6  }
  0x89   :  { %v30_v8 = vld [vmem:[#allocation0] sm:$0x1] }
  0x8a   :  { %32 = vst [vmem:[%s56_s1] sm:$0x1] %v30_v8 }

// kernel: decoder_block_forward.1
= control target key start
LH: loop header
LB: loop body
LE: loop exit
PB: predicated region body
PF: predicated region fallthrough
CT: control target
= control target key end

     0   :  { %s5825_s24 = smov 0   ;;  %s7358_s0 = inlined_call_operand.vmem [shape: bf16[2,96,4], index: 0, kind: input, shape index: {}]   ;;  %s7359_s1 = inlined_call_operand.vmem [shape: bf16[2,96,32], index: 1, kind: input, shape index: {}]   ;;  %s7360_s2 = inlined_call_operand.vmem [shape: bf16[9,4,32], index: 2, kind: input, shape index: {}]   ;;  %s7361_s3 = inlined_call_operand.vmem [shape: f32[1,32], index: 3, kind: input, shape index: {}]   ;;  %s7362_s4 = inlined_call_operand.vmem [shape: bf16[9,32,32], index: 4, kind: input, shape index: {}]   ;;  %s7363_s5 = inlined_call_operand.vmem [shape: bf16[9,32,32], index: 5, kind: input, shape index: {}]   ;;  %s7364_s6 = inlined_call_operand.vmem [shape: f32[1,32], index: 6, kind: input, shape index: {}]   ;;  %s7365_s7 = inlined_call_operand.vmem [shape: f32[2,64,32], index: 7, kind: output, shape index: {}]  }
   0x1 LB: > { %s4716_s25 = sadd.s32 4294967295, %s5782_s24   ;;  %p4720_p0 = scmp.ge.s32.totalorder %s5782_s24, 1  ;;  %s5782_s24 = sphi %s5825_s24, %s17_s24  }
   0x2   : > { %p247_p1 = scmp.lt.s32.totalorder %s5782_s24, 3 }
   0x4   : > { %p248_p2 = pnand %p4720_p0, %p247_p1 }
   0x6   : > { %251 = sbr.rel (%p248_p2) target bundleno = 770 (0x302), region = 48 }
   0xd   : > { %v4725_v0 = vld [vmem:[%s7360_s2 + $0x2] sm:$0x3]  ;;  %vm615_vm0 = vcmask 1041408   ;;  %p284_p3 = scmp.lt.s32.totalorder %s4716_s25, 1  ;;  %v302_v1 = vlaneseq  ;;  %vm602_vm1 = vcmask 31744   ;;  %v7372_v24 = vmov 0  }
   0xe   : > { %5695 = vmatprep.subr.msk.bf16.mxu0 %vm615_vm0, %v4725_v0  ;;  %v617_v2 = vsel %vm615_vm0, %v4725_v0, 0  ;;  %v579_v4 = vld [vmem:[%s7360_s2] sm:$0x3]  ;;  %v4743_v5 = vld [vmem:[%s7360_s2 + $0x4] sm:$0x3] }
   0xf   : > { %5186 = vmatpush3.bf16.msra.mxu0 %v617_v2  ;;  %s7594_s25 = smov (!%p284_p3, %s4716_s25), 1  ;;  %v5840_v3 = vshrl.u32 %v302_v1, 7  ;;  %vm7367_vm2 = vsmask.f32 3328  ;;  %vm480_vm3 = vsmask.f32 7440 }
  0x10   : > { %s5704_s9 = smul.u32 48, %s7594_s25  ;;  %5696 = vmatprep.subr.msk.bf16.mxu0 %vm615_vm0, %v579_v4  ;;  %vm7366_vm4 = vsmask.f32 256  ;;  %vm865_vm5 = vsmask.f32 4368  ;;  %v765_v9 = vsel %vm615_vm0, %v579_v4, 0 }
  0x11   : > { %v304_v6 = vadd.s32 8, %v5840_v3  ;;  %v315_v7 = vand.u32 7, %v5840_v3  ;;  %v5853_v8 = vadd.s32 16, %v5840_v3  ;;  %v5857_v10 = vadd.s32 24, %v5840_v3  ;;  %s5031_s27 = sshll.u32 %s7594_s25, 6 }
  0x12   : > { %v5860_v11 = vadd.s32 32, %v5840_v3  ;;  %s5867_s12 = scalar_lea.vmem %s7358_s0, %s5704_s9  ;;  %v5874_v14 = vadd.s32 40, %v5840_v3  ;;  %v5877_v15 = vsel %vm615_vm0, %v4743_v5, 0  ;;  %s6416_s8 = scalar_lea.vmem %s7359_s1, %s5704_s9 }
  0x13   : > { %v322_v12 = vand.u32 7, %v304_v6  ;;  %vm5869_vm6 = vcmp.gt.s32.totalorder %v315_v7, 0  ;;  %vm5879_vm7 = vcmp.lt.s32.totalorder %v315_v7, 7  ;;  %v5884_v17 = vld [vmem:[%s5867_s12 + $0x4] sm:$0xf]  ;;  %v329_v19 = vand.u32 7, %v5853_v8  ;;  %s7337_s29 = scalar_lea.vmem %s7365_s7, %s5031_s27 }
  0x14   : > { %v5887_v18 = vld [vmem:[%s5867_s12 + $0x8] sm:$0xf]  ;;  %vm463_vm10 = vmpackc.low %vm5869_vm6, %vm5869_vm6  ;;  %v5900_v22 = vld [vmem:[%s5867_s12 + $0xc] sm:$0xf]  ;;  %v336_v29 = vand.u32 7, %v5857_v10 }
  0x15   : > { %vm408_vm8 = vcmp.gt.s32.totalorder %v322_v12, 0  ;;  %vm5890_vm9 = vcmp.lt.s32.totalorder %v322_v12, 7  ;;  %v4726_v21 = vcombine.low %v5884_v17, %v5887_v18  ;;  %v5903_v23 = vld [vmem:[%s5867_s12 + $0x10] sm:$0xf]  ;;  %v5906_v25 = vsel %vm463_vm10, 65537, %v7372_v24  ;;  %vm848_vm12 = vmpackc.low %vm5879_vm7, %vm5879_vm7 }
  0x16   : > { %vm464_vm11 = vmpackc.low %vm408_vm8, %vm408_vm8  ;;  %7412 = vst [vmem:[#allocation2_spill] sm:$0xff] %v5906_v25  ;;  %v5910_v26 = vcombine.low %v5900_v22, %v5903_v23  ;;  %v5913_v27 = vld [vmem:[%s5867_s12 + $0x14] sm:$0xf]  ;;  %v5916_v28 = vld [vmem:[%s5867_s12 + $0x18] sm:$0xf]  ;;  %v483_v31 = vshll.u32 %v5906_v25, 16 }
  0x17   : > { %v5920_v30 = vsel %vm464_vm11, 65537, %v7372_v24  ;;  %v486_v32 = vshrl.u32 %v5906_v25, 16  ;;  %5187 = vmatprep.mubr.msk.bf16.mxu0 %vm602_vm1, %v4726_v21  ;;  %v5930_v33 = vcombine.low %v5913_v27, %v5916_v28  ;;  %v423_v34 = vld [vmem:[%s5867_s12] sm:$0xf]  ;;  %vm849_vm13 = vmpackc.low %vm5890_vm9, %vm5890_vm9  ;;  %v5939_v37 = vsel %vm848_vm12, 65537, %v7372_v24 }
  0x18   : > { %7413 = vst [vmem:[#allocation3_spill] sm:$0xff] %v5920_v30  ;;  %v492_v35 = vshll.u32 %v5920_v30, 16  ;;  %v496_v36 = vshrl.u32 %v5920_v30, 16  ;;  %7414 = vst [vmem:[#allocation4_spill] sm:$0xff] %v5939_v37  ;;  %5188 = vmatmul.mubr.msk.bf16.vlgmr.msra.gmra.mrb[0].mxu0 %vm602_vm1, %v5910_v26  ;;  %vm5945_vm14 = vcmp.gt.s32.totalorder %v329_v19, 0  ;;  %v5949_v39 = vrot.slane %v483_v31, 5 }
  0x19   : > { %v488_v40 = vrot.slane %v486_v32, 4  ;;  %v5952_v41 = vsel %vm849_vm13, 65537, %v7372_v24  ;;  %v868_v42 = vshrl.u32 %v5939_v37, 16  ;;  %5196 = vmatpush3.bf16.msra.mxu0 %v765_v9  ;;  %5191 = vmatprep.mubr.msk.bf16.mxu0 %vm602_vm1, %v5930_v33  ;;  %v5958_v43 = vld [vmem:[%s5867_s12 + $0x1c] sm:$0xf]  ;;  %v871_v46 = vshll.u32 %v5939_v37, 16  ;;  %vm465_vm6 = vmpackc.low %vm5945_vm14, %vm5945_vm14 }
  0x1a   : > { %7417 = vst [vmem:[#allocation5_spill] sm:$0xff] %v5949_v39  ;;  %7418 = vst [vmem:[#allocation6_spill] sm:$0xff] %v5952_v41  ;;  %v494_v44 = vrot.slane %v492_v35, 5  ;;  %v498_v45 = vrot.slane %v496_v36, 4  ;;  %v876_v47 = vshrl.u32 %v5952_v41, 16  ;;  %5697 = vmatprep.subr.msk.bf16.mxu0 %vm615_vm0, %v4743_v5  ;;  %vm7368_vm15 = vcmp.ne.s16.totalorder %v5949_v39, 0 }
  0x1b   : > { %v5963_v48 = vld [vmem:[%s5867_s12 + $0x20] sm:$0xf]  ;;  %v489_v49 = vor.u32 %v488_v40, %v5949_v39  ;;  %v870_v50 = vrot.slane %v868_v42, 7  ;;  %v879_v51 = vshll.u32 %v5952_v41, 16  ;;  %vm5974_vm7 = vmor %vm7367_vm2, %vm480_vm3  ;;  %v570_v54 = vsel %vm7368_vm15, %v423_v34, 0 }
  0x1c   : > { %v499_v53 = vor.u32 %v498_v45, %v494_v44  ;;  %v5980_v55 = vrot.slane %v876_v47, 7  ;;  %v5985_v56 = vsel %vm7368_vm15, %v5884_v17, 0  ;;  %vm5989_vm8 = vmor %vm7366_vm4, %vm865_vm5  ;;  %v5997_v61 = vcombine.low %v5958_v43, %v5963_v48 }
  0x1d   : > { %v490_v57 = vrot.slane %v489_v49, 4  ;;  %v5993_v59 = vor.u32 %v871_v46, %v870_v50  ;;  %v874_v60 = vrot.slane %v870_v50, 4  ;;  %vm410_vm3 = vcmp.gt.s32.totalorder %v336_v29, 0 }
  0x1e   : > { %v500_v62 = vrot.slane %v499_v53, 4  ;;  %v881_v63 = vor.u32 %v879_v51, %v5980_v55  ;;  %v6003_v0 = vsel %vm465_vm6, 65537, %v7372_v24  ;;  %vm466_vm9 = vmpackc.low %vm410_vm3, %vm410_vm3  ;;  %v343_v46 = vand.u32 7, %v5860_v11 }
  0x1f   : > { %7423 = vst [vmem:[#allocation7_spill] sm:$0xff] %v6003_v0  ;;  %v495_v1 = vsel %vm5974_vm7, %v490_v57, %v494_v44  ;;  %vm7374_vm5 = vcmp.ne.s16.totalorder %v5993_v59, 0  ;;  %v502_v2 = vshll.u32 %v6003_v0, 16  ;;  %v506_v4 = vshrl.u32 %v6003_v0, 16 }
  0x20   : > { %vm6010_vm10 = vcmp.ne.s16.totalorder %v495_v1, 0  ;;  %v6016_v6 = vsel %vm5989_vm8, %v874_v60, %v881_v63  ;;  %v6021_v7 = vsel %vm7374_vm5, %v5884_v17, 0  ;;  %5192 = vmatmul.mubr.msk.bf16.gmra.mrb[4].mxu0 %vm602_vm1, %v5997_v61  ;;  %v6026_v9 = vsel %vm466_vm9, 65537, %v7372_v24 }
  0x21   : > { %7426 = vst [vmem:[#allocation8_spill] sm:$0xff] %v6026_v9  ;;  %v571_v12 = vsel %vm6010_vm10, %v5884_v17, 0  ;;  %vm7369_vm11 = vcmp.ne.s16.totalorder %v6016_v6, 0  ;;  %v1107_v13 = vsel %vm6010_vm10, %v5887_v18, 0  ;;  %v504_v16 = vrot.slane %v502_v2, 5 }
  0x22   : > { %v4734_v20 = vcombine.low %v570_v54, %v571_v12  ;;  %v6038_v21 = vsel %vm7369_vm11, %v5887_v18, 0  ;;  %v508_v31 = vrot.slane %v506_v4, 4  ;;  %v512_v34 = vshll.u32 %v6026_v9, 16 }
  0x23   : > { %v505_v32 = vsel %vm5974_vm7, %v500_v62, %v504_v16  ;;  %v516_v17 = vshrl.u32 %v6026_v9, 16  ;;  %v350_v51 = vand.u32 7, %v5874_v14  ;;  %vm411_vm13 = vcmp.gt.s32.totalorder %v343_v46, 0 }
  0x24   : > { %v509_v35 = vor.u32 %v508_v31, %v504_v16  ;;  %vm6044_vm12 = vcmp.ne.s16.totalorder %v505_v32, 0  ;;  %v709_v38 = vshrl.u32 %v4734_v20, 16  ;;  %v712_v40 = vshll.u32 %v4734_v20, 16  ;;  %vm467_vm3 = vmpackc.low %vm411_vm13, %vm411_vm13 }
  0x25   : > { %v514_v42 = vrot.slane %v512_v34, 5  ;;  %v518_v44 = vrot.slane %v516_v17, 4  ;;  %v572_v45 = vsel %vm6044_vm12, %v5887_v18, 0  ;;  %v6056_v54 = vadd.s32 48, %v5840_v3 }
  0x26   : > { %v510_v47 = vrot.slane %v509_v35, 4  ;;  %v711_v49 = vrot.slane %v709_v38, 3  ;;  %v714_v50 = vrot.slane %v712_v40, 4  ;;  %v6059_v57 = vadd.s32 56, %v5840_v3 }
  0x27   : > { %v519_v53 = vor.u32 %v518_v44, %v514_v42  ;;  %vm7394_vm14 = vsmask.f32 4352  ;;  %vm412_vm6 = vcmp.gt.s32.totalorder %v350_v51, 0  ;;  %vm6067_vm9 = vcmp.lt.s32.totalorder %v329_v19, 7 }
  0x28   : > { %v515_v60 = vsel %vm5974_vm7, %v510_v47, %v514_v42  ;;  %v715_v62 = vor.u32 %v714_v50, %v711_v49  ;;  %vm468_vm2 = vmpackc.low %vm412_vm6, %vm412_vm6  ;;  %v6076_v3 = vsel %vm467_vm3, 65537, %v7372_v24  ;;  %v7371_v4 = vand.u32 7, %v6056_v54 }
  0x29   : > { %v520_v1 = vrot.slane %v519_v53, 4  ;;  %vm6071_vm4 = vcmp.ne.s16.totalorder %v515_v60, 0  ;;  %7433 = vst [vmem:[#allocation9_spill] sm:$0xff] %v6076_v3  ;;  %v6083_v8 = vsel %vm468_vm2, 65537, %v7372_v24  ;;  %v522_v19 = vshll.u32 %v6076_v3, 16  ;;  %vm850_vm11 = vmpackc.low %vm6067_vm9, %vm6067_vm9  ;;  %v5774_v53 = vld [vmem:[%s7362_s4 + $0x40] sm:$0xff]  }
  0x2a   : > { %v573_v12 = vsel %vm6071_vm4, %v5900_v22, 0  ;;  %7434 = vst [vmem:[#allocation10_spill] sm:$0xff] %v6083_v8  ;;  %v526_v16 = vshrl.u32 %v6076_v3, 16  ;;  %v532_v31 = vshll.u32 %v6083_v8, 16  ;;  %v7370_v32 = vand.u32 7, %v6059_v57 }
  0x2b   : > { %v4735_v20 = vcombine.low %v572_v45, %v573_v12  ;;  %vm413_vm13 = vcmp.gt.s32.totalorder %v7371_v4, 0  ;;  %v524_v34 = vrot.slane %v522_v19, 5  ;;  %v536_v35 = vshrl.u32 %v6083_v8, 16 }
  0x2c   : > { %v528_v17 = vrot.slane %v526_v16, 4  ;;  %vm469_vm6 = vmpackc.low %vm413_vm13, %vm413_vm13  ;;  %vm6094_vm2 = vcmp.lt.s32.totalorder %v336_v29, 7  ;;  %v534_v44 = vrot.slane %v532_v31, 5  ;;  %vm414_vm3 = vcmp.gt.s32.totalorder %v7370_v32, 0 }
  0x2d   : > { %v717_v40 = vshrl.u32 %v4735_v20, 16  ;;  %v720_v42 = vshll.u32 %v4735_v20, 16  ;;  %v525_v45 = vsel %vm5974_vm7, %v520_v1, %v524_v34  ;;  %vm470_vm15 = vmpackc.low %vm414_vm3, %vm414_vm3  ;;  %v6103_v49 = vsel %vm469_vm6, 65537, %v7372_v24 }
  0x2e   : > { %v529_v47 = vor.u32 %v528_v17, %v524_v34  ;;  %7437 = vst [vmem:[#allocation11_spill] sm:$0xff] %v6103_v49  ;;  %v538_v50 = vrot.slane %v536_v35, 4  ;;  %vm6105_vm13 = vcmp.ne.s16.totalorder %v525_v45, 0  ;;  %v6110_v60 = vsel %vm470_vm15, 65537, %v7372_v24  ;;  %vm851_vm15 = vmpackc.low %vm6094_vm2, %vm6094_vm2 }
  0x2f   : > { %v719_v10 = vrot.slane %v717_v40, 3  ;;  %v722_v29 = vrot.slane %v720_v42, 4  ;;  %7440 = vst [vmem:[#allocation12_spill] sm:$0xff] %v6110_v60  ;;  %v574_v12 = vsel %vm6105_vm13, %v5903_v23, 0  ;;  %v542_v16 = vshll.u32 %v6103_v49, 16 }
  0x30   : > { %v530_v1 = vrot.slane %v529_v47, 4  ;;  %v539_v19 = vor.u32 %v538_v50, %v534_v44  ;;  %v546_v31 = vshrl.u32 %v6103_v49, 16  ;;  %v552_v34 = vshll.u32 %v6110_v60, 16 }
  0x31   : > { %v723_v20 = vor.u32 %v722_v29, %v719_v10  ;;  %v556_v17 = vshrl.u32 %v6110_v60, 16  ;;  %v544_v40 = vrot.slane %v542_v16, 5  ;;  %v6128_v42 = vsel %vm850_vm11, 65537, %v7372_v24 }
  0x32   : > { %v535_v63 = vsel %vm5974_vm7, %v530_v1, %v534_v44  ;;  %v540_v35 = vrot.slane %v539_v19, 4  ;;  %7441 = vst [vmem:[#allocation13_spill] sm:$0xff] %v6128_v42  ;;  %v548_v50 = vrot.slane %v546_v31, 4  ;;  %v554_v10 = vrot.slane %v552_v34, 5 }
  0x33   : > { %v724_v45 = vsel %vm7394_vm14, %v715_v62, %v723_v20  ;;  %vm6131_vm9 = vcmp.ne.s16.totalorder %v535_v63, 0  ;;  %v558_v29 = vrot.slane %v556_v17, 4  ;;  %v6142_v1 = vsel %vm851_vm15, 65537, %v7372_v24 }
  0x34   : > { %5197 = vmatprep.mubr.msk.bf16.mxu0 %vm602_vm1, %v724_v45  ;;  %v575_v38 = vsel %vm6131_vm9, %v5913_v27, 0  ;;  %v545_v44 = vsel %vm5974_vm7, %v540_v35, %v544_v40  ;;  %7444 = vst [vmem:[#allocation14_spill] sm:$0xff] %v6142_v1  ;;  %v6146_v62 = vcombine.low %v6021_v7, %v6038_v21  ;;  %v549_v16 = vor.u32 %v548_v50, %v544_v40 }
  0x35   : > { %v4736_v19 = vcombine.low %v574_v12, %v575_v38  ;;  %vm6148_vm11 = vcmp.ne.s16.totalorder %v545_v44, 0  ;;  %v559_v34 = vor.u32 %v558_v29, %v554_v10  ;;  %v883_v63 = vrot.slane %v5980_v55, 4 }
  0x36   : > { %v885_v45 = vshrl.u32 %v6128_v42, 16  ;;  %v888_v17 = vshll.u32 %v6128_v42, 16  ;;  %v550_v4 = vrot.slane %v549_v16, 4  ;;  %v894_v24 = vshrl.u32 %v6142_v1, 16 }
  0x37   : > { %v726_v35 = vshrl.u32 %v4736_v19, 16  ;;  %v729_v32 = vshll.u32 %v4736_v19, 16  ;;  %v576_v7 = vsel %vm6148_vm11, %v5916_v28, 0  ;;  %v6159_v21 = vrot.slane %v559_v34, 4 }
  0x38   : > { %v887_v12 = vrot.slane %v885_v45, 7  ;;  %v897_v40 = vshll.u32 %v6142_v1, 16  ;;  %v555_v38 = vsel %vm5974_vm7, %v550_v4, %v554_v10  ;;  %v6164_v44 = vrot.slane %v894_v24, 7 }
  0x39   : > { %v728_v50 = vrot.slane %v726_v35, 3  ;;  %v731_v55 = vrot.slane %v729_v32, 4  ;;  %vm6166_vm6 = vcmp.ne.s16.totalorder %v555_v38, 0  ;;  %vm7375_vm2 = vcmp.ne.s16.totalorder %v6159_v21, 0 }
  0x3a   : > { %v890_v19 = vor.u32 %v888_v17, %v887_v12  ;;  %v892_v16 = vrot.slane %v887_v12, 4  ;;  %v577_v45 = vsel %vm6166_vm6, %v5958_v43, 0  ;;  %v578_v52 = vsel %vm7375_vm2, %v5963_v48, 0 }
  0x3b   : > { %v732_v34 = vor.u32 %v731_v55, %v728_v50  ;;  %v899_v24 = vor.u32 %v897_v40, %v6164_v44  ;;  %v6183_v4 = vcombine.low %v5985_v56, %v1107_v13  ;;  %v4737_v32 = vcombine.low %v576_v7, %v577_v45  ;;  %v6199_v56 = vld [vmem:[%s7360_s2 + $0x6] sm:$0x3] }
  0x3c   : > { %v4738_v10 = vcombine.low %v578_v52, %v578_v52  ;;  %v6187_v17 = vsel %vm5989_vm8, %v883_v63, %v890_v19  ;;  %vm7386_vm3 = vsmask.f32 7424  ;;  %v983_v40 = vshrl.u32 %v6146_v62, 16  ;;  %v5723_v13 = vld [vmem:[%s7362_s4 + $0x40] sm:$0xff]  }
  0x3d   : > { %v733_v35 = vsel %vm7394_vm14, %v723_v20, %v732_v34  ;;  %v6192_v12 = vsel %vm5989_vm8, %v892_v16, %v899_v24  ;;  %vm7376_vm7 = vcmp.ne.s16.totalorder %v6187_v17, 0  ;;  %v5724_v20 = vld [vmem:[%s7362_s4 + $0x48] sm:$0xff]   ;;  %v735_v63 = vshrl.u32 %v4737_v32, 16  ;;  %5491 = vmatprep.subr.bf16.mxu1 %v5723_v13 }
  0x3e   : > { %5198 = vmatmul.mubr.msk.bf16.vlgmr.msra.gmra.mrb[0].mxu0 %vm602_vm1, %v733_v35  ;;  %v738_v7 = vshll.u32 %v4737_v32, 16  ;;  %v744_v50 = vshrl.u32 %v4738_v10, 16  ;;  %v747_v55 = vshll.u32 %v4738_v10, 16  ;;  %vm7379_vm15 = vcmp.ne.s16.totalorder %v6192_v12, 0  ;;  %5493 = vmatpush3.bf16.msra.mxu1 %v5723_v13 }
  0x3f   : > { %5206 = vmatpush3.bf16.msra.mxu0 %v5877_v15  ;;  %v949_v38 = vsel %vm7376_vm7, %v5900_v22, 0  ;;  %v985_v19 = vshll.u32 %v6146_v62, 16  ;;  %vm419_vm5 = vcmp.lt.s32.totalorder %v343_v46, 7  ;;  %v737_v16 = vrot.slane %v735_v63, 3  ;;  %5492 = vmatprep.subr.bf16.mxu1 %v5724_v20  ;;  %v6229_v62 = vld [vmem:[%s7362_s4 + $0x50] sm:$0xff]  }
  0x40   : > { %v740_v45 = vrot.slane %v738_v7, 4  ;;  %v746_v52 = vrot.slane %v744_v50, 3  ;;  %v749_v24 = vrot.slane %v747_v55, 4  ;;  %5698 = vmatprep.subr.msk.bf16.mxu0 %vm615_vm0, %v6199_v56  ;;  %vm852_vm2 = vmpackc.low %vm419_vm5, %vm419_vm5  ;;  %v950_v15 = vsel %vm7379_vm15, %v5903_v23, 0 }
  0x41   : > { %v987_v32 = vrot.slane %v985_v19, 1  ;;  %vm420_vm7 = vcmp.lt.s32.totalorder %v350_v51, 7  ;;  %v7449_v11 = vmov 0   ;;  %v4745_v13 = vcombine.low %v949_v38, %v950_v15 }
  0x42   : > { %v6224_v46 = vsel %vm852_vm2, 65537, %v7449_v11  ;;  %v741_v10 = vor.u32 %v740_v45, %v737_v16  ;;  %v750_v35 = vor.u32 %v749_v24, %v746_v52  ;;  %vm853_vm5 = vmpackc.low %vm420_vm7, %vm420_vm7  ;;  %v901_v7 = vrot.slane %v6164_v44, 4  ;;  %5494 = vmatpush3.bf16.msra.mxu1 %v5724_v20 }
  0x43   : > { %7450 = vst [vmem:[#allocation15_spill] sm:$0xff] %v6224_v46  ;;  %v903_v63 = vshrl.u32 %v6224_v46, 16  ;;  %v988_v50 = vor.u32 %v987_v32, %v983_v40  ;;  %v6234_v14 = vsel %vm853_vm5, 65537, %v7449_v11  ;;  %v906_v51 = vshll.u32 %v6224_v46, 16  ;;  %5335 = vmatprep.subr.bf16.mxu1 %v6229_v62 }
  0x44   : > { %7451 = vst [vmem:[#allocation16_spill] sm:$0xff] %v6234_v14  ;;  %v742_v55 = vsel %vm7394_vm14, %v732_v34, %v741_v10  ;;  %v751_v19 = vsel %vm7394_vm14, %v741_v10, %v750_v35  ;;  %v990_v42 = vshll.u32 %v4745_v13, 16  ;;  %v994_v1 = vshrl.u32 %v4745_v13, 16 }
  0x45   : > { %5201 = vmatprep.mubr.msk.bf16.mxu0 %vm602_vm1, %v742_v55  ;;  %v905_v38 = vrot.slane %v903_v63, 7  ;;  %v912_v16 = vshrl.u32 %v6234_v14, 16  ;;  %v915_v44 = vshll.u32 %v6234_v14, 16  ;;  %v7452_v40 = vand.u32 7, %v6056_v54 }
  0x46   : > { %5202 = vmatmul.mubr.msk.bf16.gmra.mrb[4].mxu0 %vm602_vm1, %v751_v19  ;;  %v992_v34 = vrot.slane %v990_v42, 1  ;;  %v7453_v45 = vand.u32 7, %v6059_v57  ;;  %v1108_v20 = vsel %vm6044_vm12, %v5900_v22, 0  ;;  %v1109_v52 = vsel %vm6071_vm4, %v5903_v23, 0 }
  0x47   : > { %vm421_vm2 = vcmp.lt.s32.totalorder %v7452_v40, 7  ;;  %v908_v24 = vor.u32 %v906_v51, %v905_v38  ;;  %v910_v54 = vrot.slane %v905_v38, 4  ;;  %v914_v15 = vrot.slane %v912_v16, 7 }
  0x48   : > { %vm422_vm7 = vcmp.lt.s32.totalorder %v7453_v45, 7  ;;  %vm854_vm5 = vmpackc.low %vm421_vm2, %vm421_vm2  ;;  %v993_v42 = vsel %vm7386_vm3, %v988_v50, %v992_v34  ;;  %v4755_v16 = vcombine.low %v1108_v20, %v1109_v52 }
  0x49   : > { %vm855_vm15 = vmpackc.low %vm422_vm7, %vm422_vm7  ;;  %v6255_v32 = vsel %vm854_vm5, 65537, %v7449_v11  ;;  %5207 = vmatprep.mubr.msk.bf16.mxu0 %vm602_vm1, %v993_v42  ;;  %v6265_v35 = vsel %vm5989_vm8, %v901_v7, %v908_v24  ;;  %v917_v13 = vor.u32 %v915_v44, %v914_v15  ;;  %v919_v63 = vrot.slane %v914_v15, 4 }
  0x4a   : > { %7454 = vst [vmem:[#allocation17_spill] sm:$0xff] %v6255_v32  ;;  %v6259_v57 = vsel %vm855_vm15, 65537, %v7449_v11  ;;  %v921_v10 = vshrl.u32 %v6255_v32, 16  ;;  %v924_v51 = vshll.u32 %v6255_v32, 16  ;;  %vm942_vm2 = vcmp.ne.s16.totalorder %v6265_v35, 0 }
  0x4b   : > { %7455 = vst [vmem:[#allocation18_spill] sm:$0xff] %v6259_v57  ;;  %v930_v50 = vshrl.u32 %v6259_v57, 16  ;;  %v933_v19 = vshll.u32 %v6259_v57, 16  ;;  %v6273_v38 = vsel %vm5989_vm8, %v910_v54, %v917_v13  ;;  %v951_v7 = vsel %vm942_vm2, %v5913_v27, 0 }
  0x4c   : > { %v923_v55 = vrot.slane %v921_v10, 7  ;;  %v1141_v44 = vshrl.u32 %v6183_v4, 16  ;;  %vm7382_vm15 = vcmp.ne.s16.totalorder %v6273_v38, 0  ;;  %v996_v15 = vor.u32 %v994_v1, %v992_v34  ;;  %v6284_v10 = vld [vmem:[%s5867_s12 + $0x24] sm:$0xf] }
  0x4d   : > { %v932_v24 = vrot.slane %v930_v50, 7  ;;  %v952_v42 = vsel %vm7382_vm15, %v5916_v28, 0  ;;  %v1144_v54 = vshll.u32 %v6183_v4, 16  ;;  %v1149_v13 = vshrl.u32 %v4755_v16, 16 }
  0x4e   : > { %v926_v40 = vor.u32 %v924_v51, %v923_v55  ;;  %v928_v45 = vrot.slane %v923_v55, 4  ;;  %v4746_v32 = vcombine.low %v951_v7, %v952_v42  ;;  %v1143_v51 = vrot.slane %v1141_v44, 3 }
  0x4f   : > { %v935_v52 = vor.u32 %v933_v19, %v932_v24  ;;  %v937_v57 = vrot.slane %v932_v24, 4  ;;  %v1146_v1 = vrot.slane %v1144_v54, 4  ;;  %v1152_v34 = vshll.u32 %v4755_v16, 16 }
  0x50   : > { %v6289_v20 = vsel %vm5989_vm8, %v919_v63, %v926_v40  ;;  %v998_v55 = vshll.u32 %v4746_v32, 16  ;;  %v1151_v7 = vrot.slane %v1149_v13, 3  ;;  %v1002_v63 = vshrl.u32 %v4746_v32, 16 }
  0x51   : > { %vm7387_vm7 = vcmp.ne.s16.totalorder %v6289_v20, 0  ;;  %v6294_v50 = vsel %vm5989_vm8, %v928_v45, %v935_v52  ;;  %vm6300_vm15 = vcmp.ne.s16.totalorder %v937_v57, 0  ;;  %v7456_v19 = vmov 0 }
  0x52   : > { %v953_v4 = vsel %vm7387_vm7, %v5958_v43, 0  ;;  %vm7385_vm5 = vcmp.ne.s16.totalorder %v6294_v50, 0  ;;  %v7457_v19 = vsel %vm6300_vm15, 4294967295, %v7456_v19  ;;  %v1154_v44 = vrot.slane %v1152_v34, 4  ;;  %v4763_v34 = vld [vmem:[%s7360_s2 + $0x8] sm:$0x3] }
  0x53   : > { %7458 = vst [vmem:[#allocation19_spill] sm:$0xff] %v7457_v19  ;;  %v1000_v40 = vrot.slane %v998_v55, 1  ;;  %v954_v58 = vsel %vm7385_vm5, %v5963_v48, 0  ;;  %v955_v16 = vsel %vm6300_vm15, %v6284_v10, 0  ;;  %v1110_v45 = vsel %vm6105_vm13, %v5913_v27, 0 }
  0x54   : > { %v1197_v32 = vsel %vm615_vm0, %v6199_v56, 0  ;;  %v4747_v57 = vcombine.low %v953_v4, %v954_v58  ;;  %v4748_v24 = vcombine.low %v955_v16, %v955_v16  ;;  %v1111_v42 = vsel %vm6131_vm9, %v5916_v28, 0 }
  0x55   : > { %v1001_v54 = vsel %vm7386_vm3, %v996_v15, %v1000_v40  ;;  %v1147_v13 = vor.u32 %v1146_v1, %v1143_v51  ;;  %v1155_v52 = vor.u32 %v1154_v44, %v1151_v7  ;;  %v4756_v55 = vcombine.low %v1110_v45, %v1111_v42 }
  0x56   : > { %5208 = vmatmul.mubr.msk.bf16.vlgmr.msra.gmra.mrb[0].mxu0 %vm602_vm1, %v1001_v54  ;;  %v1004_v11 = vor.u32 %v1002_v63, %v1000_v40  ;;  %v1006_v46 = vshll.u32 %v4747_v57, 16  ;;  %v1010_v56 = vshrl.u32 %v4747_v57, 16  ;;  %v1014_v4 = vshll.u32 %v4748_v24, 16 }
  0x57   : > { %5216 = vmatpush3.bf16.msra.mxu0 %v1197_v32  ;;  %v1158_v58 = vshrl.u32 %v4756_v55, 16  ;;  %v1161_v16 = vshll.u32 %v4756_v55, 16  ;;  %v1112_v15 = vsel %vm6148_vm11, %v5958_v43, 0  ;;  %v1113_v51 = vsel %vm6166_vm6, %v5963_v48, 0 }
  0x58   : > { %v1008_v1 = vrot.slane %v1006_v46, 1  ;;  %v1016_v7 = vrot.slane %v1014_v4, 1  ;;  %5699 = vmatprep.subr.msk.bf16.mxu0 %vm615_vm0, %v4763_v34  ;;  %v4757_v44 = vcombine.low %v1112_v15, %v1113_v51  ;;  %vm7459_vm8 = vcmp.ne.s16.totalorder %v6159_v21, 0 }
  0x59   : > { %v1114_v63 = vsel %vm7459_vm8, %v6284_v10, 0  ;;  %v1160_v40 = vrot.slane %v1158_v58, 3  ;;  %v1163_v45 = vrot.slane %v1161_v16, 4  ;;  %v1156_v55 = vsel %vm7394_vm14, %v1147_v13, %v1155_v52 }
  0x5a   : > { %v1009_v32 = vsel %vm7386_vm3, %v1004_v11, %v1008_v1  ;;  %v1012_v57 = vor.u32 %v1010_v56, %v1008_v1  ;;  %v1167_v24 = vshrl.u32 %v4757_v44, 16  ;;  %v1170_v42 = vshll.u32 %v4757_v44, 16 }
  0x5b   : > { %5211 = vmatprep.mubr.msk.bf16.mxu0 %vm602_vm1, %v1009_v32  ;;  %v4758_v54 = vcombine.low %v1114_v63, %v1114_v63  ;;  %v1164_v51 = vor.u32 %v1163_v45, %v1160_v40  ;;  %vm7460_vm8 = vcmp.ne.s16.totalorder %v5993_v59, 0  ;;  %vm7461_vm5 = vcmp.ne.s16.totalorder %v6016_v6, 0 }
  0x5c   : > { %v1017_v46 = vsel %vm7386_vm3, %v1012_v57, %v1016_v7  ;;  %v1169_v4 = vrot.slane %v1167_v24, 3  ;;  %v1172_v15 = vrot.slane %v1170_v42, 4  ;;  %v1368_v56 = vsel %vm7460_vm8, %v5887_v18, 0 }
  0x5d   : > { %v1176_v58 = vshrl.u32 %v4758_v54, 16  ;;  %v1179_v16 = vshll.u32 %v4758_v54, 16  ;;  %v1369_v1 = vsel %vm7461_vm5, %v5900_v22, 0  ;;  %v1165_v13 = vsel %vm7394_vm14, %v1155_v52, %v1164_v51  ;;  %v4772_v52 = vld [vmem:[%s7360_s2 + $0xa] sm:$0x3] }
  0x5e   : > { %5212 = vmatmul.mubr.msk.bf16.gmra.mrb[4].mxu0 %vm602_vm1, %v1017_v46  ;;  %v1173_v11 = vor.u32 %v1172_v15, %v1169_v4  ;;  %vm7462_vm3 = vcmp.ne.s16.totalorder %v6187_v17, 0  ;;  %vm7463_vm7 = vcmp.ne.s16.totalorder %v6192_v12, 0  ;;  %v1293_v45 = vsel %vm615_vm0, %v4763_v34, 0  ;;  %v6372_v4 = vld [vmem:[%s5867_s12 + $0x28] sm:$0xf] }
  0x5f   : > { %5217 = vmatprep.mubr.msk.bf16.mxu0 %vm602_vm1, %v1156_v55  ;;  %v1178_v7 = vrot.slane %v1176_v58, 3  ;;  %v1181_v44 = vrot.slane %v1179_v16, 4  ;;  %v1370_v63 = vsel %vm7462_vm3, %v5903_v23, 0  ;;  %v1371_v40 = vsel %vm7463_vm7, %v5913_v27, 0 }
  0x60   : > { %v1174_v32 = vsel %vm7394_vm14, %v1164_v51, %v1173_v11  ;;  %v4773_v57 = vcombine.low %v1368_v56, %v1369_v1  ;;  %v1372_v24 = vsel %vm942_vm2, %v5916_v28, 0  ;;  %v4774_v42 = vcombine.low %v1370_v63, %v1371_v40 }
  0x61   : > { %vm7464_vm3 = vcmp.ne.s16.totalorder %v6273_v38, 0  ;;  %vm7465_vm7 = vcmp.ne.s16.totalorder %v6289_v20, 0  ;;  %vm7466_vm5 = vcmp.ne.s16.totalorder %v6294_v50, 0  ;;  %v1182_v55 = vor.u32 %v1181_v44, %v1178_v7 }
  0x62   : > { %v1373_v54 = vsel %vm7464_vm3, %v5958_v43, 0  ;;  %v1374_v34 = vsel %vm7465_vm7, %v5963_v48, 0  ;;  %v1375_v46 = vsel %vm7466_vm5, %v6284_v10, 0  ;;  %vm7467_vm8 = vcmp.ne.s16.totalorder %v5949_v39, 0 }
  0x63   : > { %v1526_v15 = vsel %vm7467_vm8, %v5887_v18, 0  ;;  %v1527_v51 = vsel %vm6010_vm10, %v5900_v22, 0  ;;  %v1405_v58 = vshll.u32 %v4773_v57, 16  ;;  %v1528_v16 = vsel %vm6044_vm12, %v5903_v23, 0 }
  0x64   : > { %v1529_v56 = vsel %vm6071_vm4, %v5913_v27, 0  ;;  %v4775_v1 = vcombine.low %v1372_v24, %v1373_v54  ;;  %v1410_v7 = vshll.u32 %v4774_v42, 16  ;;  %v1376_v44 = vsel %vm6300_vm15, %v6372_v4, 0 }
  0x65   : > { %v4783_v63 = vcombine.low %v1526_v15, %v1527_v51  ;;  %v1183_v40 = vsel %vm7394_vm14, %v1173_v11, %v1182_v55  ;;  %v1403_v14 = vshrl.u32 %v4773_v57, 16  ;;  %v1407_v37 = vrot.slane %v1405_v58, 1  ;;  %v4782_v58 = vld [vmem:[%s7360_s2 + $0xc] sm:$0x3] }
  0x66   : > { %5218 = vmatmul.mubr.msk.bf16.vlgmr.msra.gmra.mrb[0].mxu0 %vm602_vm1, %v1165_v13  ;;  %v4776_v13 = vcombine.low %v1374_v34, %v1375_v46  ;;  %v1414_v41 = vshrl.u32 %v4774_v42, 16  ;;  %v1418_v49 = vshll.u32 %v4775_v1, 16  ;;  %v4777_v3 = vcombine.low %v1376_v44, %v1376_v44  ;;  %v6524_v42 = vld [vmem:[%s6416_s8 + $0x28] sm:$0xf] }
  0x67   : > { %5226 = vmatpush3.bf16.msra.mxu0 %v1293_v45  ;;  %5221 = vmatprep.mubr.msk.bf16.mxu0 %vm602_vm1, %v1174_v32  ;;  %v4764_v45 = vcombine.low %v5887_v18, %v5900_v22  ;;  %v4784_v32 = vcombine.low %v1528_v16, %v1529_v56  ;;  %v1412_v24 = vrot.slane %v1410_v7, 1  ;;  %v1561_v54 = vshrl.u32 %v4783_v63, 16 }
  0x68   : > { %5700 = vmatprep.subr.msk.bf16.mxu0 %vm615_vm0, %v4772_v52  ;;  %v1426_v60 = vshll.u32 %v4776_v13, 16  ;;  %v1530_v34 = vsel %vm6105_vm13, %v5916_v28, 0  ;;  %v1531_v11 = vsel %vm6131_vm9, %v5958_v43, 0  ;;  %v1564_v18 = vshll.u32 %v4783_v63, 16 }
  0x69   : > { %v1569_v22 = vshrl.u32 %v4784_v32, 16  ;;  %v1572_v57 = vshll.u32 %v4784_v32, 16  ;;  %v4765_v46 = vcombine.low %v5903_v23, %v5913_v27  ;;  %v1408_v55 = vor.u32 %v1407_v37, %v1403_v14 }
  0x6a   : > { %v1422_v15 = vshrl.u32 %v4775_v1, 16  ;;  %v1451_v51 = vsel %vm615_vm0, %v4772_v52, 0  ;;  %v1428_v16 = vrot.slane %v1426_v60, 1  ;;  %v1430_v56 = vshrl.u32 %v4776_v13, 16  ;;  %v434_v13 = vld [vmem:[%s5867_s12 + $0x2c] sm:$0xf] }
  0x6b   : > { %v1434_v7 = vshll.u32 %v4777_v3, 16  ;;  %v4766_v44 = vcombine.low %v5916_v28, %v5958_v43  ;;  %v1416_v63 = vor.u32 %v1414_v41, %v1412_v24  ;;  %v1563_v23 = vrot.slane %v1561_v54, 3 }
  0x6c   : > { %v1566_v27 = vrot.slane %v1564_v18, 4  ;;  %v1571_v37 = vrot.slane %v1569_v22, 3  ;;  %v1574_v60 = vrot.slane %v1572_v57, 4  ;;  %v4767_v3 = vcombine.low %v5963_v48, %v6284_v10 }
  0x6d   : > { %vm7468_vm3 = vsmask.f32 7424  ;;  %v6422_v41 = vsel %vm615_vm0, %v4782_v58, 0  ;;  %v1436_v14 = vrot.slane %v1434_v7, 1  ;;  %v1532_v52 = vsel %vm6148_vm11, %v5963_v48, 0 }
  0x6e   : > { %5222 = vmatmul.mubr.msk.bf16.gmra.mrb[4].mxu0 %vm602_vm1, %v1183_v40  ;;  %v1420_v40 = vrot.slane %v1418_v49, 1  ;;  %v1413_v28 = vsel %vm7468_vm3, %v1408_v55, %v1412_v24  ;;  %v1432_v49 = vor.u32 %v1430_v56, %v1428_v16  ;;  %v1533_v1 = vsel %vm6166_vm6, %v6284_v10, 0  ;;  %vm7469_vm7 = vmmov %vm7468_vm3  ;;  %v6454_v55 = vld [vmem:[%s6416_s8 + $0x20] sm:$0xf] }
  0x6f   : > { %5227 = vmatprep.mubr.msk.bf16.mxu0 %vm602_vm1, %v4764_v45  ;;  %v4785_v45 = vcombine.low %v1530_v34, %v1531_v11  ;;  %vm7470_vm5 = vcmp.ne.s16.totalorder %v6159_v21, 0  ;;  %vm7471_vm8 = vcmp.ne.s16.totalorder %v6289_v20, 0  ;;  %v6442_v34 = vld [vmem:[%s6416_s8 + $0x18] sm:$0xf]  ;;  %v1567_v11 = vor.u32 %v1566_v27, %v1563_v23  ;;  %v6479_v23 = vld [vmem:[%s6416_s8 + $0x10] sm:$0xf] }
  0x70   : > { %v1424_v43 = vor.u32 %v1422_v15, %v1420_v40  ;;  %v6433_v32 = vsel %vm7469_vm7, %v1416_v63, %v1420_v40  ;;  %v1534_v54 = vsel %vm7470_vm5, %v6372_v4, 0  ;;  %v1782_v48 = vsel %vm7471_vm8, %v6284_v10, 0  ;;  %v6468_v63 = vld [vmem:[%s6416_s8 + $0x8] sm:$0xf]  ;;  %vm7474_vm5 = vmmov %vm7469_vm7 }
  0x71   : > { %v1578_v24 = vshrl.u32 %v4785_v45, 16  ;;  %v6445_v18 = vor.u32 %v1574_v60, %v1571_v37  ;;  %v1581_v22 = vshll.u32 %v4785_v45, 16  ;;  %vm7472_vm3 = vcmp.ne.s16.totalorder %v6294_v50, 0  ;;  %7473 = vst [vmem:[#allocation20_spill] sm:$0xff] %v6468_v63 }
  0x72   : > { %v1783_v57 = vsel %vm7472_vm3, %v6372_v4, 0  ;;  %v6458_v15 = vsel %vm7469_vm7, %v1424_v43, %v1428_v16  ;;  %v1784_v7 = vsel %vm6300_vm15, %v434_v13, 0  ;;  %v6471_v40 = vsel %vm7474_vm5, %v1432_v49, %v1436_v14  ;;  %v6476_v16 = vld [vmem:[%s6416_s8 + $0xc] sm:$0xf] }
  0x73   : > { %v4802_v56 = vcombine.low %v1782_v48, %v1783_v57  ;;  %v6473_v45 = vcombine.low %v1534_v54, %v1534_v54  ;;  %vm2011_vm8 = vcmask 261120   ;;  %v6481_v27 = vrot.slane %v1578_v24, 3  ;;  %v5728_v24 = vld [vmem:[%s7362_s4 + $0x58] sm:$0xff]  }
  0x74   : > { %v6490_v49 = vsel %vm7394_vm14, %v1567_v11, %v6445_v18  ;;  %v6492_v14 = vrot.slane %v1581_v22, 4  ;;  %vm7475_vm3 = vcmp.ne.s16.totalorder %v5993_v59, 0  ;;  %vm7476_vm7 = vcmp.ne.s16.totalorder %v6016_v6, 0 }
  0x75   : > { %v1834_v37 = vshll.u32 %v4802_v56, 16  ;;  %v1838_v60 = vshrl.u32 %v4802_v56, 16  ;;  %v2701_v11 = vsel %vm7475_vm3, %v6468_v63, 0  ;;  %v2702_v22 = vsel %vm7476_vm7, %v6476_v16, 0 }
  0x76   : > { %5228 = vmatmul.mubr.msk.bf16.vlgmr.msra.gmra.mrb[0].mxu0 %vm602_vm1, %v4765_v46  ;;  %v6451_v46 = vld [vmem:[%s6416_s8 + $0x1c] sm:$0xf]  ;;  %vm7477_vm5 = vcmp.ne.s16.totalorder %v6187_v17, 0  ;;  %vm7478_vm14 = vcmp.ne.s16.totalorder %v6192_v12, 0  ;;  %vm7480_vm3 = vcmp.ne.s16.totalorder %v6289_v20, 0  ;;  %v2709_v8 = vsel %vm6300_vm15, %v6524_v42, 0 }
  0x77   : > { %5236 = vmatpush3.bf16.msra.mxu0 %v1451_v51  ;;  %5231 = vmatprep.mubr.msk.bf16.mxu0 %vm602_vm1, %v4766_v44  ;;  %v6460_v51 = vcombine.low %v1532_v52, %v1533_v1  ;;  %v6465_v44 = vld [vmem:[%s6416_s8 + $0x24] sm:$0xf]  ;;  %v4870_v43 = vcombine.low %v6442_v34, %v6451_v46  ;;  %v6486_v52 = vld [vmem:[%s6416_s8 + $0x14] sm:$0xf]  ;;  %v6500_v48 = vrot.slane %v1834_v37, 1  ;;  %v2703_v56 = vsel %vm7477_vm5, %v6479_v23, 0 }
  0x78   : > { %5701 = vmatprep.subr.msk.bf16.mxu0 %vm615_vm0, %v4782_v58  ;;  %v4803_v58 = vcombine.low %v1784_v7, %v1784_v7  ;;  %v4871_v13 = vcombine.low %v6454_v55, %v6465_v44  ;;  %v2704_v7 = vsel %vm7478_vm14, %v6486_v52, 0  ;;  %vm7479_vm14 = vcmp.ne.s16.totalorder %v6273_v38, 0 }
  0x79   : > { %5331 = vmatprep.mubr.msk.bf16.mxu1 %vm2011_vm8, %v4870_v43  ;;  %v1840_v43 = vor.u32 %v1838_v60, %v6500_v48  ;;  %v2707_v60 = vsel %vm7480_vm3, %v6454_v55, 0  ;;  %vm7481_vm7 = vsmask.f32 7424  ;;  %vm7482_vm5 = vcmp.ne.s16.totalorder %v6294_v50, 0 }
  0x7a   : > { %v1842_v1 = vshll.u32 %v4803_v58, 16  ;;  %5332 = vmatmul.mubr.msk.bf16.vlgmr.msra.gmra.mrb[0].mxu1 %vm2011_vm8, %v4871_v13  ;;  %v4882_v58 = vcombine.low %v2701_v11, %v2702_v22  ;;  %v2705_v13 = vsel %vm942_vm2, %v6442_v34, 0  ;;  %vm7484_vm3 = vmmov %vm7481_vm7  ;;  %v2420_v5 = vsel %vm6131_vm9, %v6442_v34, 0 }
  0x7b   : > { %5336 = vmatpush3.bf16.msra.mxu1 %v6229_v62  ;;  %v2706_v62 = vsel %vm7479_vm14, %v6451_v46, 0  ;;  %vm7483_vm14 = vcmp.ne.s16.totalorder %v5949_v39, 0 }
  0x7c   : > { %v1844_v57 = vrot.slane %v1842_v1, 1  ;;  %v4883_v1 = vcombine.low %v2703_v56, %v2704_v7  ;;  %5337 = vmatprep.subr.bf16.mxu1 %v5728_v24  ;;  %v2739_v54 = vshrl.u32 %v4882_v58, 16  ;;  %v2741_v11 = vshll.u32 %v4882_v58, 16 }
  0x7d   : > { %v4884_v7 = vcombine.low %v2705_v13, %v2706_v62  ;;  %v2708_v58 = vsel %vm7482_vm5, %v6465_v44, 0  ;;  %v2871_v0 = vsel %vm7483_vm14, %v6468_v63, 0  ;;  %v4886_v13 = vcombine.low %v2709_v8, %v2709_v8  ;;  %vm7486_vm5 = vmmov %vm7484_vm3 }
  0x7e   : > { %5232 = vmatmul.mubr.msk.bf16.gmra.mrb[4].mxu0 %vm602_vm1, %v4767_v3  ;;  %v5729_v3 = vld [vmem:[%s7362_s4 + $0x60] sm:$0xff]   ;;  %v6537_v22 = vsel %vm7481_vm7, %v1840_v43, %v1844_v57  ;;  %v2746_v56 = vshll.u32 %v4883_v1, 16  ;;  %v2743_v37 = vrot.slane %v2741_v11, 1  ;;  %v4885_v43 = vcombine.low %v2707_v60, %v2708_v58  ;;  %vm7485_vm7 = vmmov %vm7484_vm3  ;;  %v5730_v58 = vld [vmem:[%s7362_s4 + $0x68] sm:$0xff]  }
  0x7f   : > { %5237 = vmatprep.mubr.msk.bf16.mxu0 %vm602_vm1, %v1413_v28  ;;  %v2750_v28 = vshrl.u32 %v4883_v1, 16  ;;  %5338 = vmatpush3.bf16.msra.mxu1 %v5728_v24  ;;  %v2754_v57 = vshll.u32 %v4884_v7, 16  ;;  %v2758_v25 = vshrl.u32 %v4884_v7, 16  ;;  %v2872_v11 = vsel %vm6010_vm10, %v6476_v16, 0  ;;  %v6557_v24 = vld [vmem:[%s7360_s2 + $0xe] sm:$0x3] }
  0x80   : > { %v2748_v9 = vrot.slane %v2746_v56, 1  ;;  %v2744_v1 = vor.u32 %v2743_v37, %v2739_v54  ;;  %5347 = vmatprep.subr.bf16.mxu1 %v5729_v3  ;;  %v2873_v62 = vsel %vm6044_vm12, %v6479_v23, 0  ;;  %v2762_v39 = vshll.u32 %v4885_v43, 16 }
  0x81   : > { %v2756_v19 = vrot.slane %v2754_v57, 1  ;;  %v2766_v63 = vshrl.u32 %v4885_v43, 16  ;;  %v2770_v8 = vshll.u32 %v4886_v13, 16  ;;  %v2874_v37 = vsel %vm6071_vm4, %v6486_v52, 0 }
  0x82   : > { %v2752_v30 = vor.u32 %v2750_v28, %v2748_v9  ;;  %v2749_v54 = vsel %vm7484_vm3, %v2744_v1, %v2748_v9  ;;  %v4897_v60 = vcombine.low %v2871_v0, %v2872_v11  ;;  %v2764_v7 = vrot.slane %v2762_v39, 1 }
  0x83   : > { %5339 = vmatprep.mubr.msk.bf16.mxu1 %vm2011_vm8, %v2749_v54  ;;  %v2760_v28 = vor.u32 %v2758_v25, %v2756_v19  ;;  %v4898_v9 = vcombine.low %v2873_v62, %v2874_v37  ;;  %v2772_v0 = vrot.slane %v2770_v8, 1  ;;  %v2876_v1 = vsel %vm6131_vm9, %v6451_v46, 0 }
  0x84   : > { %v2757_v56 = vsel %vm7485_vm7, %v2752_v30, %v2756_v19  ;;  %v2909_v57 = vshrl.u32 %v4897_v60, 16  ;;  %v2912_v43 = vshll.u32 %v4897_v60, 16  ;;  %v2768_v30 = vor.u32 %v2766_v63, %v2764_v7 }
  0x85   : > { %5340 = vmatmul.mubr.msk.bf16.vlgmr.msra.gmra.mrb[4].mxu1 %vm2011_vm8, %v2757_v56  ;;  %v2765_v25 = vsel %vm7486_vm5, %v2760_v28, %v2764_v7  ;;  %v2917_v39 = vshrl.u32 %v4898_v9, 16  ;;  %v2920_v19 = vshll.u32 %v4898_v9, 16  ;;  %v2877_v13 = vsel %vm6148_vm11, %v6454_v55, 0 }
  0x86   : > { %5238 = vmatmul.mubr.msk.bf16.vlgmr.msra.gmra.mrb[0].mxu0 %vm602_vm1, %v6433_v32  ;;  %v2875_v32 = vsel %vm6105_vm13, %v6442_v34, 0  ;;  %5348 = vmatpush3.bf16.msra.mxu1 %v5729_v3  ;;  %v7487_v11 = vshrl.u32 %v6460_v51, 16  ;;  %v5731_v3 = vld [vmem:[%s7362_s4 + $0x70] sm:$0xff]   ;;  %v7488_v37 = vshll.u32 %v6460_v51, 16  ;;  %v2878_v28 = vsel %vm6166_vm6, %v6465_v44, 0 }
  0x87   : > { %5246 = vmatpush3.bf16.msra.mxu0 %v6422_v41  ;;  %5241 = vmatprep.mubr.msk.bf16.mxu0 %vm602_vm1, %v6458_v15  ;;  %v2911_v41 = vrot.slane %v2909_v57, 3  ;;  %v2914_v15 = vrot.slane %v2912_v43, 4  ;;  %v2919_v63 = vrot.slane %v2917_v39, 3  ;;  %v2922_v54 = vrot.slane %v2920_v19, 4 }
  0x88   : > { %5702 = vmatprep.subr.msk.bf16.mxu0 %vm615_vm0, %v6557_v24  ;;  %5343 = vmatprep.mubr.msk.bf16.mxu1 %vm2011_vm8, %v2765_v25  ;;  %v1589_v62 = vrot.slane %v7487_v11, 3  ;;  %v4899_v8 = vcombine.low %v2875_v32, %v2876_v1  ;;  %v1592_v60 = vrot.slane %v7488_v37, 4  ;;  %vm7489_vm14 = vcmp.ne.s16.totalorder %v6159_v21, 0 }
  0x89   : > { %5349 = vmatprep.subr.bf16.mxu1 %v5730_v58  ;;  %v2915_v56 = vor.u32 %v2914_v15, %v2911_v41  ;;  %v2879_v7 = vsel %vm7489_vm14, %v6524_v42, 0  ;;  %v2923_v9 = vor.u32 %v2922_v54, %v2919_v63  ;;  %v4900_v25 = vcombine.low %v2877_v13, %v2878_v28 }
  0x8a   : > { %v2926_v57 = vshrl.u32 %v4899_v8, 16  ;;  %v2929_v43 = vshll.u32 %v4899_v8, 16  ;;  %v2773_v39 = vsel %vm7484_vm3, %v2768_v30, %v2772_v0  ;;  %5350 = vmatpush3.bf16.msra.mxu1 %v5730_v58  ;;  %v4901_v32 = vcombine.low %v2879_v7, %v2879_v7 }
  0x8b   : > { %vm7490_vm7 = vsmask.f32 4352  ;;  %5359 = vmatprep.subr.bf16.mxu1 %v5731_v3  ;;  %v2935_v15 = vshrl.u32 %v4900_v25, 16  ;;  %v1584_v1 = vor.u32 %v6492_v14, %v6481_v27  ;;  %v1596_v13 = vshrl.u32 %v6473_v45, 16 }
  0x8c   : > { %v2924_v51 = vsel %vm7490_vm7, %v2915_v56, %v2923_v9  ;;  %v2928_v19 = vrot.slane %v2926_v57, 3  ;;  %v2931_v41 = vrot.slane %v2929_v43, 4  ;;  %v1599_v58 = vshll.u32 %v6473_v45, 16  ;;  %vm7491_vm5 = vmmov %vm7490_vm7  ;;  %v5732_v57 = vld [vmem:[%s7362_s4 + $0x78] sm:$0xff]  }
  0x8d   : > { %v2938_v0 = vshll.u32 %v4900_v25, 16  ;;  %v1593_v30 = vor.u32 %v1592_v60, %v1589_v62  ;;  %5344 = vmatmul.mubr.msk.bf16.gmra.mrb[0].mxu1 %vm2011_vm8, %v2773_v39  ;;  %v2944_v54 = vshrl.u32 %v4901_v32, 16  ;;  %v2947_v8 = vshll.u32 %v4901_v32, 16  ;;  %vm7492_vm14 = vmmov %vm7491_vm5  ;;  %v4798_v60 = vld [vmem:[%s7360_s2 + $0x10] sm:$0x3] }
  0x8e   : > { %5242 = vmatmul.mubr.msk.bf16.gmra.mrb[4].mxu0 %vm602_vm1, %v6471_v40  ;;  %v2937_v40 = vrot.slane %v2935_v15, 3  ;;  %5351 = vmatprep.mubr.msk.bf16.mxu1 %vm2011_vm8, %v2924_v51  ;;  %v2932_v11 = vor.u32 %v2931_v41, %v2928_v19  ;;  %v1598_v37 = vrot.slane %v1596_v13, 3  ;;  %v1601_v27 = vrot.slane %v1599_v58, 4  ;;  %vm7493_vm3 = vmmov %vm7491_vm5  ;;  %v5769_v25 = vld [vmem:[%s5867_s12 + $0x10] sm:$0xf]  ;;  %v5734_v51 = vld [vmem:[%s7362_s4 + $0x80] sm:$0xff]  }
  0x8f   : > { %5247 = vmatprep.mubr.msk.bf16.mxu0 %vm602_vm1, %v6490_v49  ;;  %v2940_v63 = vrot.slane %v2938_v0, 4  ;;  %v1585_v49 = vsel %vm7491_vm5, %v6445_v18, %v1584_v1  ;;  %v1701_v45 = vsel %vm615_vm0, %v6557_v24, 0  ;;  %v1594_v62 = vsel %vm7492_vm14, %v1584_v1, %v1593_v30  ;;  %vm7494_vm7 = vmmov %vm7493_vm3  ;;  %v5770_v15 = vld [vmem:[%s5867_s12 + $0x14] sm:$0xf]  ;;  %v5771_v13 = vld [vmem:[%s5867_s12 + $0x18] sm:$0xf] }
  0x90   : > { %v2933_v56 = vsel %vm7493_vm3, %v2923_v9, %v2932_v11  ;;  %v2946_v28 = vrot.slane %v2944_v54, 3  ;;  %v2949_v7 = vrot.slane %v2947_v8, 4  ;;  %v1602_v24 = vor.u32 %v1601_v27, %v1598_v37  ;;  %v5768_v9 = vld [vmem:[%s5867_s12 + $0xc] sm:$0xf]  ;;  %v5773_v8 = vld [vmem:[%s5867_s12 + $0x20] sm:$0xf] }
  0x91   : > { %v2941_v14 = vor.u32 %v2940_v63, %v2937_v40  ;;  %vm7495_vm5 = vcmp.ne.s16.totalorder %v5993_v59, 0  ;;  %vm7496_vm14 = vcmp.ne.s16.totalorder %v6016_v6, 0  ;;  %v6649_v0 = vcombine.low %v6476_v16, %v6479_v23  ;;  %v5772_v63 = vld [vmem:[%s5867_s12 + $0x1c] sm:$0xf] }
  0x92   : > { %v1776_v43 = vsel %vm7495_vm5, %v5768_v9, 0  ;;  %v1777_v39 = vsel %vm7496_vm14, %v5769_v25, 0  ;;  %v2950_v32 = vor.u32 %v2949_v7, %v2946_v28  ;;  %v1603_v19 = vsel %vm7493_vm3, %v1593_v30, %v1602_v24  ;;  %vm7499_vm14 = vmmov %vm7493_vm3 }
  0x93   : > { %v2942_v18 = vsel %vm7494_vm7, %v2932_v11, %v2941_v14  ;;  %v4799_v41 = vcombine.low %v1776_v43, %v1777_v39  ;;  %vm7497_vm7 = vcmp.ne.s16.totalorder %v6187_v17, 0  ;;  %vm7498_vm5 = vcmp.ne.s16.totalorder %v6192_v12, 0 }
  0x94   : > { %v1778_v1 = vsel %vm7497_vm7, %v5770_v15, 0  ;;  %v2951_v58 = vsel %vm7499_vm14, %v2941_v14, %v2950_v32  ;;  %v1859_v11 = vsel %vm615_vm0, %v4798_v60, 0  ;;  %v1780_v54 = vsel %vm942_vm2, %v5772_v63, 0 }
  0x95   : > { %5352 = vmatmul.mubr.msk.bf16.vlgmr.msra.gmra.mrb[4].mxu1 %vm2011_vm8, %v2933_v56  ;;  %v1813_v40 = vshll.u32 %v4799_v41, 16  ;;  %vm7500_vm3 = vcmp.ne.s16.totalorder %v6273_v38, 0  ;;  %v1811_v37 = vshrl.u32 %v4799_v41, 16  ;;  %v6666_v14 = vcombine.low %v6486_v52, %v6442_v34 }
  0x96   : > { %5248 = vmatmul.mubr.msk.bf16.vlgmr.msra.gmra.mrb[0].mxu0 %vm602_vm1, %v1585_v49  ;;  %5360 = vmatpush3.bf16.msra.mxu1 %v5731_v3  ;;  %v1779_v3 = vsel %vm7498_vm5, %v5771_v13, 0  ;;  %v1781_v49 = vsel %vm7500_vm3, %v5773_v8, 0  ;;  %v4912_v24 = vcombine.low %v6465_v44, %v6524_v42  ;;  %vm7505_vm14 = vcmp.ne.s16.totalorder %v5993_v59, 0 }
  0x97   : > { %5256 = vmatpush3.bf16.msra.mxu0 %v1701_v45  ;;  %5251 = vmatprep.mubr.msk.bf16.mxu0 %vm602_vm1, %v1594_v62  ;;  %v4800_v30 = vcombine.low %v1778_v1, %v1779_v3  ;;  %v1815_v27 = vrot.slane %v1813_v40, 1  ;;  %v6670_v45 = vcombine.low %v6451_v46, %v6454_v55  ;;  %v4801_v62 = vcombine.low %v1780_v54, %v1781_v49 }
  0x98   : > { %5703 = vmatprep.subr.msk.bf16.mxu0 %vm615_vm0, %v4798_v60  ;;  %5355 = vmatprep.mubr.msk.bf16.mxu1 %vm2011_vm8, %v2942_v18  ;;  %v5737_v60 = vld [vmem:[%s7362_s4 + $0x88] sm:$0xff]   ;;  %vm7501_vm0 = vsmask.f32 7424  ;;  %vm7506_vm3 = vcmp.ne.s16.totalorder %v6016_v6, 0 }
  0x99   : > { %5361 = vmatprep.subr.bf16.mxu1 %v5732_v57  ;;  %v1816_v56 = vor.u32 %v1815_v27, %v1811_v37  ;;  %v1826_v7 = vshll.u32 %v4801_v62, 16  ;;  %vm7503_vm7 = vmmov %vm7501_vm0 }
  0x9a   : > { %5362 = vmatpush3.bf16.msra.mxu1 %v5732_v57  ;;  %v1830_v57 = vshrl.u32 %v4801_v62, 16  ;;  %vm7504_vm5 = vmmov %vm7501_vm0 }
  0x9b   : > { %5371 = vmatprep.subr.bf16.mxu1 %v5734_v51  ;;  %v1828_v9 = vrot.slane %v1826_v7, 1 }
  0x9d   : > { %5356 = vmatmul.mubr.msk.bf16.gmra.mrb[0].mxu1 %vm2011_vm8, %v2951_v58  ;;  %v1832_v25 = vor.u32 %v1830_v57, %v1828_v9 }
  0x9e   : > { %5252 = vmatmul.mubr.msk.bf16.gmra.mrb[4].mxu0 %vm602_vm1, %v1603_v19  ;;  %5363 = vmatprep.mubr.msk.bf16.mxu1 %vm2011_vm8, %v6649_v0 }
  0x9f   : > { %5257 = vmatprep.mubr.msk.bf16.mxu0 %vm602_vm1, %v5910_v26  ;;  %v1818_v26 = vshll.u32 %v4800_v30, 16  ;;  %v1837_v32 = vsel %vm7504_vm5, %v1832_v25, %v6500_v48 }
  0xa1   : > { %v1820_v28 = vrot.slane %v1818_v26, 1 }
  0xa3   : > { %v1821_v18 = vsel %vm7501_vm0, %v1816_v56, %v1820_v28  ;;  %vm7507_vm0 = vcmp.ne.s16.totalorder %v6187_v17, 0  ;;  %v446_v56 = vld [vmem:[%s6416_s8 + $0x2c] sm:$0xf] }
  0xa4   : > { %v3153_v7 = vsel %vm6300_vm15, %v446_v56, 0 }
  0xa5   : > { %5364 = vmatmul.mubr.msk.bf16.vlgmr.msra.gmra.mrb[4].mxu1 %vm2011_vm8, %v6666_v14 }
  0xa6   : > { %5258 = vmatmul.mubr.msk.bf16.vlgmr.msra.gmra.mrb[0].mxu0 %vm602_vm1, %v5930_v33  ;;  %5372 = vmatpush3.bf16.msra.mxu1 %v5734_v51  ;;  %v1822_v33 = vshrl.u32 %v4800_v30, 16  ;;  %v3147_v51 = vsel %vm7507_vm0, %v6486_v52, 0  ;;  %vm7512_vm0 = vmmov %vm7504_vm5 }
  0xa7   : > { %5266 = vmatpush3.bf16.msra.mxu0 %v1859_v11  ;;  %5261 = vmatprep.mubr.msk.bf16.mxu0 %vm602_vm1, %v5997_v61  ;;  %v7502_v61 = vcombine.low %v6284_v10, %v6372_v4  ;;  %v3145_v10 = vsel %vm7505_vm14, %v6476_v16, 0  ;;  %v3146_v4 = vsel %vm7506_vm3, %v6479_v23, 0  ;;  %vm7510_vm14 = vcmp.ne.s16.totalorder %v6289_v20, 0 }
  0xa8   : > { %5367 = vmatprep.mubr.msk.bf16.mxu1 %vm2011_vm8, %v6670_v45  ;;  %5373 = vmatprep.subr.bf16.mxu1 %v5737_v60  ;;  %v1824_v43 = vor.u32 %v1822_v33, %v1820_v28  ;;  %v4923_v19 = vcombine.low %v3145_v10, %v3146_v4  ;;  %v3151_v27 = vsel %vm7510_vm14, %v6465_v44, 0  ;;  %vm7511_vm3 = vcmp.ne.s16.totalorder %v6294_v50, 0  ;;  %v5740_v4 = vld [vmem:[%s7363_s5 + $0x8] sm:$0xff]   ;;  %v5756_v28 = vld [vmem:[%s7362_s4 + $0x38] sm:$0xff]  }
  0xa9   : > { %v3152_v26 = vsel %vm7511_vm3, %v6524_v42, 0  ;;  %v5739_v42 = vld [vmem:[%s7363_s5] sm:$0xff]   ;;  %vm7519_vm14 = vsmask.f32 4352 }
  0xaa   : > { %5374 = vmatpush3.bf16.msra.mxu1 %v5737_v60  ;;  %v1829_v39 = vsel %vm7503_vm7, %v1824_v43, %v1828_v9  ;;  %vm7508_vm7 = vcmp.ne.s16.totalorder %v6192_v12, 0  ;;  %v3185_v15 = vshll.u32 %v4923_v19, 16  ;;  %v3183_v58 = vshrl.u32 %v4923_v19, 16  ;;  %v5743_v19 = vld [vmem:[%s7362_s4 + $0x18] sm:$0xff]   ;;  %vm7520_vm3 = vmmov %vm7519_vm14 }
  0xab   : > { %v3148_v48 = vsel %vm7508_vm7, %v6442_v34, 0  ;;  %v4926_v60 = vcombine.low %v3151_v27, %v3152_v26  ;;  %5383 = vmatprep.subr.bf16.mxu1 %v5739_v42  ;;  %vm7514_vm7 = vmmov %vm7512_vm0  ;;  %v5748_v26 = vld [vmem:[%s7362_s4 + $0x8] sm:$0xff]  }
  0xac   : > { %v4924_v41 = vcombine.low %v3147_v51, %v3148_v48  ;;  %v3187_v30 = vrot.slane %v3185_v15, 1  ;;  %v5741_v51 = vld [vmem:[%s7362_s4 + $0x10] sm:$0xff]  }
  0xad   : > { %5368 = vmatmul.mubr.msk.bf16.gmra.mrb[0].mxu1 %vm2011_vm8, %v4912_v24  ;;  %v3206_v33 = vshll.u32 %v4926_v60, 16  ;;  %5275 = vmatprep.subr.bf16.mxu0 %v5741_v51  ;;  %v6746_v48 = vld [vmem:[%s7363_s5 + $0x10] sm:$0xff]  }
  0xae   : > { %5262 = vmatmul.mubr.msk.bf16.gmra.mrb[4].mxu0 %vm602_vm1, %v7502_v61  ;;  %v3190_v13 = vshll.u32 %v4924_v41, 16  ;;  %v3194_v11 = vshrl.u32 %v4924_v41, 16  ;;  %v3188_v54 = vor.u32 %v3187_v30, %v3183_v58  ;;  %v3210_v61 = vshrl.u32 %v4926_v60, 16  ;;  %v6753_v41 = vld [vmem:[%s6416_s8 + $0x4] sm:$0xf]  ;;  %v7516_v15 = vld [vmem:[#allocation20_spill] sm:$0xff] }
  0xaf   : > { %5267 = vmatprep.mubr.msk.bf16.mxu0 %vm602_vm1, %v1821_v18  ;;  %v4927_v18 = vcombine.low %v3153_v7, %v3153_v7  ;;  %v3208_v24 = vrot.slane %v3206_v33, 1  ;;  %v1964_v30 = vsel %vm6071_vm4, %v6476_v16, 0 }
  0xb0   : > { %v3192_v40 = vrot.slane %v3190_v13, 1  ;;  %v435_v13 = vld [vmem:[%s6416_s8] sm:$0xf] }
  0xb1   : > { %v3214_v9 = vshll.u32 %v4927_v18, 16  ;;  %v3212_v25 = vor.u32 %v3210_v61, %v3208_v24 }
  0xb2   : > { %v3196_v8 = vor.u32 %v3194_v11, %v3192_v40  ;;  %v3193_v37 = vsel %vm7504_vm5, %v3188_v54, %v3192_v40 }
  0xb3   : > { %5375 = vmatprep.mubr.msk.bf16.mxu1 %vm2011_vm8, %v3193_v37 }
  0xb6   : > { %5268 = vmatmul.mubr.msk.bf16.vlgmr.msra.gmra.mrb[0].mxu0 %vm602_vm1, %v1829_v39  ;;  %v3216_v39 = vrot.slane %v3214_v9, 1 }
  0xb7   : > { %5271 = vmatprep.mubr.msk.bf16.mxu0 %vm602_vm1, %v1837_v32  ;;  %5276 = vmatpush3.bf16.msra.mxu0 %v5741_v51  ;;  %v5750_v51 = vld [vmem:[%s7362_s4 + $0x20] sm:$0xff]  }
  0xb8   : > { %5277 = vmatprep.subr.bf16.mxu0 %v5743_v19 }
  0xbb   : > { %5278 = vmatpush3.bf16.msra.mxu0 %v5743_v19 }
  0xbe   : > { %5272 = vmatmul.mubr.msk.bf16.gmra.mrb[4].mxu0 %vm602_vm1, %v6537_v22  ;;  %v3149_v22 = vsel %vm942_vm2, %v6451_v46, 0  ;;  %vm7509_vm1 = vcmp.ne.s16.totalorder %v6273_v38, 0 }
  0xbf   : > { %v3150_v1 = vsel %vm7509_vm1, %v6454_v55, 0  ;;  %vm7515_vm1 = vmmov %vm7512_vm0 }
  0xc0   : > { %v4925_v3 = vcombine.low %v3149_v22, %v3150_v1  ;;  %v3217_v10 = vsel %vm7515_vm1, %v3212_v25, %v3216_v39  ;;  %v4813_v22 = vcombine.low %v6753_v41, %v7516_v15  ;;  %v5746_v1 = vld [vmem:[%s7362_s4] sm:$0xff]   ;;  %v1967_v39 = vsel %vm6148_vm11, %v6442_v34, 0 }
  0xc1   : > { %5287 = vmatprep.subr.bf16.mxu0 %v5746_v1  ;;  %vm7523_vm1 = vcmp.ne.s16.totalorder %v5993_v59, 0  ;;  %v2249_v59 = vsel %vm942_vm2, %v6486_v52, 0  ;;  %vm7528_vm2 = vcmp.ne.s16.totalorder %v6289_v20, 0 }
  0xc2   : > { %v3198_v63 = vshll.u32 %v4925_v3, 16  ;;  %v3202_v57 = vshrl.u32 %v4925_v3, 16  ;;  %5279 = vmatprep.mubr.msk.bf16.mxu0 %vm2011_vm8, %v4813_v22  ;;  %v7517_v3 = vld [vmem:[#allocation5_spill] sm:$0xff] }
  0xc3   : > { %vm7518_vm5 = vcmp.ne.s16.totalorder %v7517_v3, 0 }
  0xc4   : > { %v3200_v49 = vrot.slane %v3198_v63, 1  ;;  %v1961_v58 = vsel %vm7518_vm5, %v435_v13, 0  ;;  %v1966_v63 = vsel %vm6131_vm9, %v6486_v52, 0  ;;  %vm7524_vm5 = vcmp.ne.s16.totalorder %v6016_v6, 0 }
  0xc6   : > { %v3201_v62 = vsel %vm7512_vm0, %v3196_v8, %v3200_v49  ;;  %v3204_v43 = vor.u32 %v3202_v57, %v3200_v49  ;;  %5280 = vmatmul.mubr.msk.bf16.vlgmr.msra.gmra.mrb[8].mxu0 %vm2011_vm8, %v6649_v0  ;;  %v1962_v0 = vsel %vm6010_vm10, %v6753_v41, 0  ;;  %vm7521_vm0 = vcmp.ne.s16.totalorder %v6159_v21, 0 }
  0xc7   : > { %5376 = vmatmul.mubr.msk.bf16.vlgmr.msra.gmra.mrb[4].mxu1 %vm2011_vm8, %v3201_v62  ;;  %5283 = vmatprep.mubr.msk.bf16.mxu0 %vm2011_vm8, %v6666_v14  ;;  %v1963_v14 = vsel %vm6044_vm12, %v7516_v15, 0  ;;  %v4823_v40 = vcombine.low %v1961_v58, %v1962_v0 }
  0xc8   : > { %v3209_v32 = vsel %vm7514_vm7, %v3204_v43, %v3208_v24  ;;  %5384 = vmatpush3.bf16.msra.mxu1 %v5739_v42  ;;  %5288 = vmatpush3.bf16.msra.mxu0 %v5746_v1  ;;  %v4824_v11 = vcombine.low %v1963_v14, %v1964_v30  ;;  %vm7522_vm7 = vmmov %vm7520_vm3 }
  0xc9   : > { %5379 = vmatprep.mubr.msk.bf16.mxu1 %vm2011_vm8, %v3209_v32  ;;  %5385 = vmatprep.subr.bf16.mxu1 %v5740_v4  ;;  %v2113_v8 = vshrl.u32 %v4823_v40, 16  ;;  %v2116_v49 = vshll.u32 %v4823_v40, 16  ;;  %v1968_v32 = vsel %vm6166_vm6, %v6451_v46, 0 }
  0xca   : > { %v2121_v37 = vshrl.u32 %v4824_v11, 16  ;;  %v2124_v27 = vshll.u32 %v4824_v11, 16  ;;  %5289 = vmatprep.subr.bf16.mxu0 %v5748_v26 }
  0xcb   : > { %v2115_v56 = vrot.slane %v2113_v8, 3  ;;  %v2118_v7 = vrot.slane %v2116_v49, 4  ;;  %v2245_v8 = vsel %vm7523_vm1, %v6753_v41, 0  ;;  %v2246_v49 = vsel %vm7524_vm5, %v7516_v15, 0 }
  0xcc   : > { %5386 = vmatpush3.bf16.msra.mxu1 %v5740_v4  ;;  %v2123_v33 = vrot.slane %v2121_v37, 3  ;;  %v2126_v18 = vrot.slane %v2124_v27, 4  ;;  %5290 = vmatpush3.bf16.msra.mxu0 %v5748_v26  ;;  %v1969_v4 = vsel %vm7521_vm0, %v6454_v55, 0  ;;  %vm7526_vm0 = vcmp.ne.s16.totalorder %v6192_v12, 0 }
  0xcd   : > { %5395 = vmatprep.subr.bf16.mxu1 %v6746_v48  ;;  %v2119_v61 = vor.u32 %v2118_v7, %v2115_v56  ;;  %v4827_v19 = vcombine.low %v1969_v4, %v1969_v4  ;;  %5299 = vmatprep.subr.bf16.mxu0 %v5750_v51  ;;  %v2248_v26 = vsel %vm7526_vm0, %v6479_v23, 0  ;;  %vm7529_vm1 = vcmp.ne.s16.totalorder %v6294_v50, 0 }
  0xce   : > { %5284 = vmatmul.mubr.msk.bf16.gmra.mrb[12].mxu0 %vm2011_vm8, %v6670_v45  ;;  %v1965_v45 = vsel %vm6105_vm13, %v6479_v23, 0  ;;  %v2127_v9 = vor.u32 %v2126_v18, %v2123_v33  ;;  %vm7530_vm5 = vsmask.f32 7424 }
  0xcf   : > { %5380 = vmatmul.mubr.msk.bf16.gmra.mrb[0].mxu1 %vm2011_vm8, %v3217_v10  ;;  %v4825_v54 = vcombine.low %v1965_v45, %v1966_v63  ;;  %v4826_v10 = vcombine.low %v1967_v39, %v1968_v32  ;;  %v2148_v13 = vshrl.u32 %v4827_v19, 16  ;;  %v2151_v58 = vshll.u32 %v4827_v19, 16 }
  0xd0   : > { %v2128_v43 = vsel %vm7519_vm14, %v2119_v61, %v2127_v9  ;;  %vm7525_vm14 = vcmp.ne.s16.totalorder %v6187_v17, 0 }
  0xd1   : > { %v2130_v62 = vshrl.u32 %v4825_v54, 16  ;;  %v2133_v60 = vshll.u32 %v4825_v54, 16  ;;  %5291 = vmatprep.mubr.msk.bf16.mxu0 %vm2011_vm8, %v2128_v43  ;;  %v2139_v22 = vshrl.u32 %v4826_v10, 16  ;;  %v2142_v1 = vshll.u32 %v4826_v10, 16  ;;  %v5752_v54 = vld [vmem:[%s7362_s4 + $0x28] sm:$0xff]  }
  0xd2   : > { %v2150_v30 = vrot.slane %v2148_v13, 3  ;;  %v2153_v40 = vrot.slane %v2151_v58, 4  ;;  %v2247_v37 = vsel %vm7525_vm14, %v6476_v16, 0  ;;  %v2253_v10 = vsel %vm6300_vm15, %v6465_v44, 0  ;;  %vm7531_vm14 = vmmov %vm7530_vm5 }
  0xd3   : > { %v2132_v57 = vrot.slane %v2130_v62, 3  ;;  %v2135_v24 = vrot.slane %v2133_v60, 4  ;;  %v2141_v0 = vrot.slane %v2139_v22, 3  ;;  %v2144_v14 = vrot.slane %v2142_v1, 4 }
  0xd4   : > { %v2154_v45 = vor.u32 %v2153_v40, %v2150_v30  ;;  %v4838_v62 = vcombine.low %v2245_v8, %v2246_v49  ;;  %v4839_v6 = vcombine.low %v2247_v37, %v2248_v26  ;;  %v4842_v4 = vcombine.low %v2253_v10, %v2253_v10 }
  0xd5   : > { %v2136_v42 = vor.u32 %v2135_v24, %v2132_v57  ;;  %v2145_v11 = vor.u32 %v2144_v14, %v2141_v0  ;;  %vm7533_vm15 = vcmp.ne.s16.totalorder %v7517_v3, 0  ;;  %v2416_v30 = vsel %vm6010_vm10, %v7516_v15, 0 }
  0xd6   : > { %v2283_v60 = vshrl.u32 %v4838_v62, 16  ;;  %v2285_v56 = vshll.u32 %v4838_v62, 16  ;;  %v2290_v33 = vshll.u32 %v4839_v6, 16  ;;  %v2294_v12 = vshrl.u32 %v4839_v6, 16 }
  0xd7   : > { %v2137_v25 = vsel %vm7520_vm3, %v2127_v9, %v2136_v42  ;;  %v2146_v63 = vsel %vm7522_vm7, %v2136_v42, %v2145_v11  ;;  %v2155_v27 = vsel %vm7520_vm3, %v2145_v11, %v2154_v45  ;;  %vm7527_vm7 = vcmp.ne.s16.totalorder %v6273_v38, 0  ;;  %vm7532_vm3 = vmmov %vm7530_vm5 }
  0xd8   : > { %5292 = vmatmul.mubr.msk.bf16.vlgmr.msra.gmra.mrb[8].mxu0 %vm2011_vm8, %v2137_v25  ;;  %v2250_v17 = vsel %vm7527_vm7, %v6442_v34, 0  ;;  %v2287_v18 = vrot.slane %v2285_v56, 1  ;;  %v2292_v24 = vrot.slane %v2290_v33, 1  ;;  %v2251_v42 = vsel %vm7528_vm2, %v6451_v46, 0  ;;  %v5754_v25 = vld [vmem:[%s7362_s4 + $0x30] sm:$0xff]   ;;  %vm7534_vm0 = vmmov %vm7532_vm3 }
  0xd9   : > { %5300 = vmatpush3.bf16.msra.mxu0 %v5750_v51  ;;  %5295 = vmatprep.mubr.msk.bf16.mxu0 %vm2011_vm8, %v2146_v63  ;;  %v4840_v7 = vcombine.low %v2249_v59, %v2250_v17  ;;  %v2252_v38 = vsel %vm7529_vm1, %v6454_v55, 0  ;;  %v2314_v22 = vshll.u32 %v4842_v4, 16  ;;  %v2415_v14 = vsel %vm7533_vm15, %v6753_v41, 0  ;;  %v7541_v4 = vld [vmem:[#allocation2_spill] sm:$0xff] }
  0xda   : > { %5301 = vmatprep.subr.bf16.mxu0 %v5752_v54  ;;  %v2288_v61 = vor.u32 %v2287_v18, %v2283_v60  ;;  %v2296_v9 = vor.u32 %v2294_v12, %v2292_v24  ;;  %v4841_v32 = vcombine.low %v2251_v42, %v2252_v38  ;;  %v2417_v40 = vsel %vm6044_vm12, %v6476_v16, 0 }
  0xdb   : > { %v2298_v57 = vshll.u32 %v4840_v7, 16  ;;  %v2302_v43 = vshrl.u32 %v4840_v7, 16  ;;  %v2316_v13 = vrot.slane %v2314_v22, 1  ;;  %v2418_v11 = vsel %vm6071_vm4, %v6479_v23, 0 }
  0xdc   : > { %v2293_v39 = vsel %vm7530_vm5, %v2288_v61, %v2292_v24  ;;  %v2306_v51 = vshll.u32 %v4841_v32, 16  ;;  %v2310_v19 = vshrl.u32 %v4841_v32, 16  ;;  %v4853_v63 = vcombine.low %v2415_v14, %v2416_v30  ;;  %v7546_v14 = vld [vmem:[#allocation12_spill] sm:$0xff]  ;;  %v7547_v30 = vld [vmem:[#allocation11_spill] sm:$0xff] }
  0xdd   : > { %5302 = vmatpush3.bf16.msra.mxu0 %v5752_v54  ;;  %v2300_v35 = vrot.slane %v2298_v57, 1  ;;  %v4854_v54 = vcombine.low %v2417_v40, %v2418_v11  ;;  %v2419_v41 = vsel %vm6105_vm13, %v6486_v52, 0  ;;  %v2421_v56 = vsel %vm6148_vm11, %v6451_v46, 0 }
  0xde   : > { %5311 = vmatprep.subr.bf16.mxu0 %v5754_v25  ;;  %v2308_v1 = vrot.slane %v2306_v51, 1  ;;  %v2453_v36 = vshrl.u32 %v4853_v63, 16  ;;  %v2456_v3 = vshll.u32 %v4853_v63, 16  ;;  %v4855_v49 = vcombine.low %v2419_v41, %v2420_v5  ;;  %v7542_v51 = vld [vmem:[#allocation8_spill] sm:$0xff] }
  0xdf   : > { %v2301_v20 = vsel %vm7531_vm14, %v2296_v9, %v2300_v35  ;;  %v2304_v50 = vor.u32 %v2302_v43, %v2300_v35  ;;  %v2461_v8 = vshrl.u32 %v4854_v54, 16  ;;  %v2464_v2 = vshll.u32 %v4854_v54, 16 }
  0xe0   : > { %5296 = vmatmul.mubr.msk.bf16.gmra.mrb[12].mxu0 %vm2011_vm8, %v2155_v27  ;;  %v2312_v0 = vor.u32 %v2310_v19, %v2308_v1  ;;  %v2455_v37 = vrot.slane %v2453_v36, 3  ;;  %v2458_v27 = vrot.slane %v2456_v3, 4  ;;  %v2470_v59 = vshrl.u32 %v4855_v49, 16  ;;  %v7543_v19 = vld [vmem:[#allocation7_spill] sm:$0xff] }
  0xe1   : > { %5303 = vmatprep.mubr.msk.bf16.mxu0 %vm2011_vm8, %v2293_v39  ;;  %v2309_v58 = vsel %vm7532_vm3, %v2304_v50, %v2308_v1  ;;  %v2463_v26 = vrot.slane %v2461_v8, 3  ;;  %v2466_v62 = vrot.slane %v2464_v2, 4  ;;  %v2473_v47 = vshll.u32 %v4855_v49, 16  ;;  %v7544_v1 = vld [vmem:[#allocation10_spill] sm:$0xff]  ;;  %v7549_v2 = vld [vmem:[#allocation4_spill] sm:$0xff] }
  0xe2   : > { %v2317_v45 = vsel %vm7534_vm0, %v2312_v0, %v2316_v13  ;;  %v2459_v34 = vor.u32 %v2458_v27, %v2455_v37  ;;  %v2472_v17 = vrot.slane %v2470_v59, 3  ;;  %v2422_v7 = vsel %vm6166_vm6, %v6454_v55, 0  ;;  %v7545_v13 = vld [vmem:[#allocation9_spill] sm:$0xff]  ;;  %v7548_v8 = vld [vmem:[#allocation6_spill] sm:$0xff] }
  0xe3   : > { %v2467_v6 = vor.u32 %v2466_v62, %v2463_v26  ;;  %v2475_v60 = vrot.slane %v2473_v47, 4  ;;  %vm7535_vm4 = vsmask.f32 4352  ;;  %v4856_v12 = vcombine.low %v2421_v56, %v2422_v7  ;;  %v7550_v37 = vld [vmem:[#allocation14_spill] sm:$0xff]  ;;  %v7551_v27 = vld [vmem:[#allocation13_spill] sm:$0xff] }
  0xe4   : > { %vm7536_vm10 = vcmp.ne.s16.totalorder %v6159_v21, 0  ;;  %vm7537_vm12 = vmmov %vm7535_vm4  ;;  %v5775_v21 = vld [vmem:[%s7362_s4 + $0x48] sm:$0xff]   ;;  %v4868_v32 = vcombine.low %v7516_v15, %v6476_v16  ;;  %v4869_v10 = vcombine.low %v6479_v23, %v6486_v52  ;;  %v6905_v22 = vcombine.low %v7543_v19, %v7542_v51  ;;  %v4808_v62 = vld [vmem:[%s7361_s3] ss:$0 sm:$0xff] }
  0xe5   : > { %v2468_v33 = vsel %vm7535_vm4, %v2459_v34, %v2467_v6  ;;  %v2423_v18 = vsel %vm7536_vm10, %v6465_v44, 0  ;;  %v2476_v57 = vor.u32 %v2475_v60, %v2472_v17  ;;  %v2479_v61 = vshrl.u32 %v4856_v12, 16  ;;  %vm7538_vm13 = vmmov %vm7535_vm4 }
  0xe6   : > { %v4857_v24 = vcombine.low %v2423_v18, %v2423_v18  ;;  %v2482_v35 = vshll.u32 %v4856_v12, 16  ;;  %vm7539_vm9 = vmmov %vm7535_vm4  ;;  %v6909_v16 = vcombine.low %v7545_v13, %v7544_v1  ;;  %v3336_v23 = vshrl.u32 %v6905_v22, 16 }
  0xe7   : > { %v2477_v31 = vsel %vm7537_vm12, %v2467_v6, %v2476_v57  ;;  %v2481_v29 = vrot.slane %v2479_v61, 3  ;;  %v3339_v52 = vshll.u32 %v6905_v22, 16  ;;  %v6919_v40 = vcombine.low %v7547_v30, %v7546_v14  ;;  %vm7560_vm3 = vmmov %vm7535_vm4 }
  0xe8   : > { %5304 = vmatmul.mubr.msk.bf16.vlgmr.msra.gmra.mrb[8].mxu0 %vm2011_vm8, %v2301_v20  ;;  %v2488_v46 = vshrl.u32 %v4857_v24, 16  ;;  %v2491_v9 = vshll.u32 %v4857_v24, 16  ;;  %v2484_v55 = vrot.slane %v2482_v35, 4  ;;  %v7540_v20 = vld [vmem:[#allocation3_spill] sm:$0xff]  ;;  %v3345_v0 = vshrl.u32 %v6909_v16, 16  ;;  %vm7561_vm15 = vmmov %vm7560_vm3 }
  0xe9   : > { %5312 = vmatpush3.bf16.msra.mxu0 %v5754_v25  ;;  %5307 = vmatprep.mubr.msk.bf16.mxu0 %vm2011_vm8, %v2309_v58  ;;  %v6901_v50 = vcombine.low %v7541_v4, %v7540_v20  ;;  %v3338_v63 = vrot.slane %v3336_v23, 4  ;;  %v3341_v54 = vrot.slane %v3339_v52, 5  ;;  %v3354_v36 = vshrl.u32 %v6919_v40, 16  ;;  %v7553_v24 = vld [vmem:[#allocation15_spill] sm:$0xff]  ;;  %vm7562_vm0 = vmmov %vm7560_vm3 }
  0xea   : > { %5313 = vmatprep.subr.bf16.mxu0 %v5756_v28  ;;  %v2490_v42 = vrot.slane %v2488_v46, 3  ;;  %v2493_v38 = vrot.slane %v2491_v9, 4  ;;  %v2485_v43 = vor.u32 %v2484_v55, %v2481_v29  ;;  %v3347_v41 = vrot.slane %v3345_v0, 4  ;;  %vm7563_vm4 = vmmov %vm7562_vm0 }
  0xeb   : > { %v3328_v15 = vshrl.u32 %v6901_v50, 16  ;;  %v3331_v58 = vshll.u32 %v6901_v50, 16  ;;  %v3357_v3 = vshll.u32 %v6919_v40, 16  ;;  %v6937_v49 = vcombine.low %v7549_v2, %v7548_v8 }
  0xec   : > { %v2494_v44 = vor.u32 %v2493_v38, %v2490_v42  ;;  %v2486_v25 = vsel %vm7538_vm13, %v2476_v57, %v2485_v43  ;;  %v6941_v26 = vcombine.low %v7551_v27, %v7550_v37  ;;  %v3342_v59 = vor.u32 %v3341_v54, %v3338_v63  ;;  %v7552_v57 = vld [vmem:[#allocation16_spill] sm:$0xff]  ;;  %v7559_v63 = vld [vmem:[#allocation17_spill] sm:$0xff] }
  0xed   : > { %5314 = vmatpush3.bf16.msra.mxu0 %v5756_v28  ;;  %v3348_v28 = vshll.u32 %v6909_v16, 16  ;;  %v3330_v11 = vrot.slane %v3328_v15, 4  ;;  %v3356_v34 = vrot.slane %v3354_v36, 4  ;;  %v3359_v6 = vrot.slane %v3357_v3, 5 }
  0xee   : > { %5323 = vmatprep.subr.bf16.mxu0 %v5774_v53  ;;  %v2495_v39 = vsel %vm7539_vm9, %v2485_v43, %v2494_v44  ;;  %v3645_v17 = vshrl.u32 %v6937_v49, 16  ;;  %v3648_v56 = vshll.u32 %v6937_v49, 16  ;;  %v3653_v7 = vshrl.u32 %v6941_v26, 16  ;;  %vm7564_vm9 = vmmov %vm7562_vm0 }
  0xef   : > { %v3350_v5 = vrot.slane %v3348_v28, 5  ;;  %v6958_v61 = vcombine.low %v7553_v24, %v7552_v57  ;;  %vm7554_vm11 = vsmask.f32 3328  ;;  %v7555_v9 = vmov 0  }
  0xf0   : > { %5308 = vmatmul.mubr.msk.bf16.gmra.mrb[12].mxu0 %vm2011_vm8, %v2317_v45  ;;  %v3333_v45 = vrot.slane %v3331_v58, 5  ;;  %v6965_v29 = vrot.slane %v7555_v9, 4  ;;  %vm7556_vm6 = vmmov %vm7554_vm11  ;;  %v3377_v43 = vrot.slane %v7555_v9, 3  ;;  %v3647_v44 = vrot.slane %v3645_v17, 3 }
  0xf1   : > { %5315 = vmatprep.mubr.msk.bf16.mxu0 %vm2011_vm8, %v2468_v33  ;;  %v3351_v47 = vor.u32 %v3350_v5, %v3347_v41  ;;  %v3656_v33 = vshll.u32 %v6941_v26, 16  ;;  %v3662_v51 = vshrl.u32 %v6958_v61, 16  ;;  %v3665_v19 = vshll.u32 %v6958_v61, 16  ;;  %vm7557_vm1 = vmmov %vm7556_vm6 }
  0xf2   : > { %v6986_v30 = vor.u32 %v6965_v29, %v3377_v43  ;;  %vm3525_vm13 = vcmask 1043456   ;;  %v3852_v40 = vrot.slane %v7555_v9, 7 }
  0xf3   : > { %v6968_v55 = vsel %vm7556_vm6, %v3342_v59, %v3351_v47  ;;  %vm7566_vm6 = vmmov %vm7562_vm0 }
  0xf4   : > { %vm3363_vm2 = vcmp.ne.s16.totalorder %v6968_v55, 0 }
  0xf8   : > { %5316 = vmatmul.mubr.msk.bf16.vlgmr.msra.gmra.mrb[8].mxu0 %vm2011_vm8, %v2477_v31 }
  0xf9   : > { %5324 = vmatpush3.bf16.msra.mxu0 %v5774_v53  ;;  %5319 = vmatprep.mubr.msk.bf16.mxu0 %vm2011_vm8, %v2486_v25  ;;  %v6946_v53 = vor.u32 %v3333_v45, %v3330_v11  ;;  %v7558_v45 = vld [vmem:[#allocation18_spill] sm:$0xff] }
  0xfa   : > { %5325 = vmatprep.subr.bf16.mxu0 %v5775_v21  ;;  %v6993_v54 = vcombine.low %v7559_v63, %v7558_v45 }
  0xfb   : > { %v6962_v46 = vsel %vm7554_vm11, %v6946_v53, %v3342_v59  ;;  %vm7565_vm11 = vmmov %vm7562_vm0 }
  0xfc   : > { %vm3362_vm7 = vcmp.ne.s16.totalorder %v6962_v46, 0 }
  0xfd   : > { %5326 = vmatpush3.bf16.msra.mxu0 %v5775_v21  ;;  %v3360_v21 = vor.u32 %v3359_v6, %v3356_v34  ;;  %v3667_v34 = vrot.slane %v3665_v19, 4 }
  0xff   : > { %v6989_v11 = vsel %vm7557_vm1, %v3351_v47, %v3360_v21  ;;  %vm3365_vm5 = vcmp.ne.s16.totalorder %v3360_v21, 0  ;;  %v3664_v47 = vrot.slane %v3662_v51, 3  ;;  %vm7567_vm1 = vsmask.f32 7424 }
 0x100   : > { %5320 = vmatmul.mubr.msk.bf16.gmra.mrb[12].mxu0 %vm2011_vm8, %v2495_v39  ;;  %v3650_v39 = vrot.slane %v3648_v56, 4  ;;  %vm3364_vm14 = vcmp.ne.s16.totalorder %v6989_v11, 0 }
 0x101   : > { %5327 = vmatprep.mubr.msk.bf16.mxu0 %vm2011_vm8, %v4868_v32  ;;  %v3655_v32 = vrot.slane %v3653_v7, 3  ;;  %v3668_v63 = vor.u32 %v3667_v34, %v3664_v47 }
 0x102   : > { %v6997_v8 = vor.u32 %v3650_v39, %v3647_v44  ;;  %v3674_v39 = vshll.u32 %v6993_v54, 16 }
 0x108   : > { %5328 = vmatmul.mubr.msk.bf16.vlgmr.msra.gmra.mrb[8].mxu0 %vm2011_vm8, %v4869_v10  ;;  %v3658_v10 = vrot.slane %v3656_v33, 4 }
 0x10a   : > { %v3659_v2 = vor.u32 %v3658_v10, %v3655_v32 }
 0x189   : > { %v5269_v60 = vpop.f32.mrb[0].mxu0 }
 0x18a   : > { %v1943_v12 = vadd.f32 %v5269_v60, %v4808_v62  ;;  %v1895_v18 = vpop.f32.mrb[1].mxu0 }
 0x18b   : > { %v1941_v35 = vadd.f32 %v4808_v62, %v1895_v18  ;;  %v5270_v31 = vpop.f32.mrb[2].mxu0 }
 0x18c   : > { %v1944_v42 = vadd.f32 %v5270_v31, %v4808_v62  ;;  %v1898_v38 = vpop.f32.mrb[3].mxu0  ;;  %v1951_v20 = vmax.f32 %v1943_v12, 0.0 }
 0x18d   : > { %v1942_v25 = vadd.f32 %v4808_v62, %v1898_v38  ;;  %v1949_v1 = vmax.f32 %v1941_v35, 0.0  ;;  %v3671_v38 = vshrl.u32 %v6993_v54, 16 }
 0x18e   : > { %v1952_v4 = vmax.f32 %v1944_v42, 0.0 }
 0x18f   : > { %v1950_v13 = vmax.f32 %v1942_v25, 0.0  ;;  %v4092_v26 = vrot.slane %v3671_v38, 7 }
 0x190   : > { %v6983_v14 = vpack.c.bf16 %v1952_v4, %v1951_v20 }
 0x191   : > { %v6995_v41 = vpack.c.bf16 %v1950_v13, %v1949_v1  ;;  %v5273_v5 = vpop.f32.mrb[4].mxu0  ;;  %v4093_v61 = vor.u32 %v4092_v26, %v3674_v39 }
 0x192   : > { %v1947_v37 = vadd.f32 %v5273_v5, %v4808_v62  ;;  %v1911_v27 = vpop.f32.mrb[5].mxu0  ;;  %v3367_v59 = vsel %vm3363_vm2, %v6983_v14, 0 }
 0x193   : > { %v1945_v6 = vadd.f32 %v4808_v62, %v1911_v27  ;;  %v5274_v60 = vpop.f32.mrb[6].mxu0  ;;  %v3366_v12 = vsel %vm3362_vm7, %v6995_v41, 0  ;;  %v3392_v18 = vshrl.u32 %v3367_v59, 16  ;;  %v3395_v57 = vshll.u32 %v3367_v59, 16 }
 0x194   : > { %v1948_v24 = vadd.f32 %v5274_v60, %v4808_v62  ;;  %v1914_v35 = vpop.f32.mrb[7].mxu0  ;;  %v3383_v31 = vshrl.u32 %v3366_v12, 16  ;;  %v3386_v42 = vshll.u32 %v3366_v12, 16  ;;  %v1955_v32 = vmax.f32 %v1947_v37, 0.0  ;;  %v5745_v60 = vld [vmem:[%s7363_s5 + $0x18] sm:$0xff]  }
 0x195   : > { %v1946_v43 = vadd.f32 %v4808_v62, %v1914_v35  ;;  %v3394_v44 = vrot.slane %v3392_v18, 3  ;;  %v3397_v25 = vrot.slane %v3395_v57, 4  ;;  %v1953_v1 = vmax.f32 %v1945_v6, 0.0 }
 0x196   : > { %v1956_v10 = vmax.f32 %v1948_v24, 0.0  ;;  %v3385_v20 = vrot.slane %v3383_v31, 3  ;;  %v3388_v4 = vrot.slane %v3386_v42, 4  ;;  %v7018_v62 = vsel %vm7560_vm3, %v6997_v8, %v3659_v2 }
 0x197   : > { %v1954_v13 = vmax.f32 %v1946_v43, 0.0  ;;  %v3398_v45 = vor.u32 %v3397_v25, %v3394_v44  ;;  %v3673_v37 = vrot.slane %v3671_v38, 3  ;;  %v3676_v6 = vrot.slane %v3674_v39, 4 }
 0x198   : > { %v7011_v5 = vpack.c.bf16 %v1956_v10, %v1955_v32  ;;  %v3389_v27 = vor.u32 %v3388_v4, %v3385_v20  ;;  %v3828_v18 = vrot.slane %v3331_v58, 1  ;;  %v7039_v31 = vsel %vm7563_vm4, %v3659_v2, %v3668_v63  ;;  %v5747_v10 = vld [vmem:[%s7363_s5 + $0x20] sm:$0xff]  }
 0x199   : > { %v7014_v59 = vpack.c.bf16 %v1954_v13, %v1953_v1  ;;  %vm3679_vm10 = vcmp.ne.s16.totalorder %v7018_v62, 0  ;;  %v3677_v44 = vor.u32 %v3676_v6, %v3673_v37  ;;  %vm3680_vm12 = vcmp.ne.s16.totalorder %v7039_v31, 0 }
 0x19a   : > { %v3390_v47 = vsel %vm7561_vm15, %v6986_v30, %v3389_v27  ;;  %v3399_v34 = vsel %vm7562_vm0, %v3389_v27, %v3398_v45  ;;  %v3369_v12 = vsel %vm3365_vm5, %v7011_v5, 0  ;;  %v3683_v20 = vsel %vm3679_vm10, %v6995_v41, 0  ;;  %vm7568_vm0 = vmmov %vm7567_vm1 }
 0x19b   : > { %5387 = vmatprep.mubr.msk.bf16.mxu1 %vm2011_vm8, %v3390_v47  ;;  %v3368_v57 = vsel %vm3364_vm14, %v7014_v59, 0  ;;  %v3410_v24 = vshrl.u32 %v3369_v12, 16  ;;  %v3413_v35 = vshll.u32 %v3369_v12, 16  ;;  %v3527_v1 = vrot.slane %v6995_v41, 4 }
 0x19c   : > { %5388 = vmatmul.mubr.msk.bf16.vlgmr.msra.gmra.mrb[4].mxu1 %vm2011_vm8, %v3399_v34  ;;  %v3401_v42 = vshrl.u32 %v3368_v57, 16  ;;  %v3404_v43 = vshll.u32 %v3368_v57, 16  ;;  %v3684_v13 = vsel %vm3680_vm12, %v6983_v14, 0  ;;  %v7058_v27 = vsel %vm7564_vm9, %v3668_v63, %v3677_v44 }
 0x19d   : > { %5396 = vmatpush3.bf16.msra.mxu1 %v6746_v48  ;;  %v3412_v58 = vrot.slane %v3410_v24, 3  ;;  %v3415_v21 = vrot.slane %v3413_v35, 4  ;;  %v3829_v48 = vor.u32 %v3828_v18, %v3328_v15  ;;  %v3830_v37 = vrot.slane %v3339_v52, 1 }
 0x19e   : > { %v3403_v25 = vrot.slane %v3401_v42, 3  ;;  %v3406_v32 = vrot.slane %v3404_v43, 4  ;;  %5397 = vmatprep.subr.bf16.mxu1 %v5745_v60  ;;  %v3696_v15 = vshrl.u32 %v3683_v20, 16  ;;  %v3699_v47 = vshll.u32 %v3683_v20, 16 }
 0x19f   : > { %v3416_v2 = vor.u32 %v3415_v21, %v3412_v58  ;;  %v3831_v34 = vsel %vm7567_vm1, %v3829_v48, %v3830_v37  ;;  %v3528_v63 = vsel %vm3525_vm13, %v6965_v29, %v3527_v1  ;;  %vm3681_vm5 = vcmp.ne.s16.totalorder %v7058_v27, 0 }
 0x1a0   : > { %v3407_v4 = vor.u32 %v3406_v32, %v3403_v25  ;;  %v3705_v52 = vshrl.u32 %v3684_v13, 16  ;;  %v3832_v12 = vor.u32 %v3830_v37, %v3336_v23  ;;  %v3833_v18 = vrot.slane %v3348_v28, 1  ;;  %v5749_v25 = vld [vmem:[%s7363_s5 + $0x28] sm:$0xff]  }
 0x1a1   : > { %5398 = vmatpush3.bf16.msra.mxu1 %v5745_v60  ;;  %v3693_v60 = vrot.slane %v7555_v9, 5  ;;  %v3698_v57 = vrot.slane %v3696_v15, 4  ;;  %v3701_v24 = vrot.slane %v3699_v47, 5  ;;  %vm3682_vm3 = vcmp.ne.s16.totalorder %v3677_v44, 0 }
 0x1a2   : > { %v3408_v6 = vsel %vm7565_vm11, %v3398_v45, %v3407_v4  ;;  %v3417_v50 = vsel %vm7566_vm6, %v3407_v4, %v3416_v2  ;;  %5407 = vmatprep.subr.bf16.mxu1 %v5747_v10  ;;  %v3708_v45 = vshll.u32 %v3684_v13, 16  ;;  %vm3839_vm15 = vcmp.ne.s16.totalorder %v3831_v34, 0  ;;  %vm7569_vm11 = vmmov %vm7568_vm0 }
 0x1a3   : > { %5391 = vmatprep.mubr.msk.bf16.mxu1 %vm2011_vm8, %v3408_v6  ;;  %v3529_v35 = vrot.slane %v6983_v14, 4  ;;  %v3685_v42 = vsel %vm3681_vm5, %v7014_v59, 0  ;;  %v3531_v43 = vrot.slane %v7014_v59, 4  ;;  %v7082_v58 = vor.u32 %v3693_v60, %v6965_v29 }
 0x1a4   : > { %5392 = vmatmul.mubr.msk.bf16.gmra.mrb[0].mxu1 %vm2011_vm8, %v3417_v50  ;;  %v3835_v22 = vor.u32 %v3833_v18, %v3345_v0  ;;  %v3707_v23 = vrot.slane %v3705_v52, 4  ;;  %v3710_v28 = vrot.slane %v3708_v45, 5  ;;  %v3686_v21 = vsel %vm3682_vm3, %v7011_v5, 0 }
 0x1a5   : > { %5399 = vmatprep.mubr.msk.bf16.mxu1 %vm2011_vm8, %v3528_v63  ;;  %v7088_v44 = vsel %vm3839_vm15, %v6995_v41, 0  ;;  %v3533_v32 = vrot.slane %v7011_v5, 4  ;;  %v3702_v2 = vor.u32 %v3701_v24, %v3698_v57  ;;  %v3714_v20 = vshrl.u32 %v3685_v42, 16 }
 0x1a6   : > { %v3834_v48 = vsel %vm7568_vm0, %v3832_v12, %v3833_v18  ;;  %v7096_v16 = vsel %vm3525_vm13, %v3527_v1, %v3529_v35  ;;  %v3717_v0 = vshll.u32 %v3685_v42, 16  ;;  %v7100_v4 = vrot.slane %v3357_v3, 1 }
 0x1a7   : > { %vm4238_vm4 = vcmp.ne.s16.totalorder %v6946_v53, 0  ;;  %v7106_v13 = vsel %vm3525_vm13, %v3529_v35, %v3531_v43  ;;  %v3723_v37 = vshrl.u32 %v3686_v21, 16  ;;  %v3726_v6 = vshll.u32 %v3686_v21, 16 }
 0x1a8   : > { %v3854_v50 = vshrl.u32 %v7088_v44, 16  ;;  %v7111_v1 = vor.u32 %v3710_v28, %v3707_v23  ;;  %vm3840_vm9 = vcmp.ne.s16.totalorder %v3834_v48, 0  ;;  %v7115_v3 = vsel %vm7569_vm11, %v3835_v22, %v7100_v4 }
 0x1a9   : > { %vm4475_vm6 = vcmp.ne.s16.totalorder %v6997_v8, 0  ;;  %v7119_v15 = vsel %vm3525_vm13, %v3531_v43, %v3533_v32  ;;  %vm7570_vm1 = vsmask.f32 3328  ;;  %v3716_v34 = vrot.slane %v3714_v20, 4 }
 0x1aa   : > { %v3703_v47 = vsel %vm7570_vm1, %v7082_v58, %v3702_v2  ;;  %v4239_v63 = vsel %vm4238_vm4, %v6995_v41, 0  ;;  %v3719_v60 = vrot.slane %v3717_v0, 5  ;;  %v4240_v52 = vsel %vm3362_vm7, %v6983_v14, 0  ;;  %vm7571_vm3 = vmmov %vm7570_vm1 }
 0x1ab   : > { %v4249_v45 = vshrl.u32 %v4239_v63, 16  ;;  %v4252_v12 = vshll.u32 %v4239_v63, 16  ;;  %v7134_v18 = vrot.slane %v3723_v37, 4  ;;  %v7136_v57 = vrot.slane %v3726_v6, 5  ;;  %vm7578_vm15 = vmmov %vm7570_vm1 }
 0x1ac   : > { %5400 = vmatmul.mubr.msk.bf16.vlgmr.msra.gmra.mrb[4].mxu1 %vm2011_vm8, %v7096_v16  ;;  %v7138_v24 = vrot.slane %v3854_v50, 7  ;;  %v4257_v35 = vshrl.u32 %v4240_v52, 16  ;;  %v3712_v42 = vsel %vm7571_vm3, %v3702_v2, %v7111_v1  ;;  %v4260_v22 = vshll.u32 %v4240_v52, 16  ;;  %vm7579_vm4 = vmmov %vm7570_vm1 }
 0x1ad   : > { %5408 = vmatpush3.bf16.msra.mxu1 %v5747_v10  ;;  %5403 = vmatprep.mubr.msk.bf16.mxu1 %vm2011_vm8, %v7106_v13  ;;  %v7126_v10 = vld [vmem:[%s7363_s5 + $0x30] sm:$0xff]   ;;  %v4251_v53 = vrot.slane %v4249_v45, 3  ;;  %v4254_v43 = vrot.slane %v4252_v12, 4  ;;  %v7145_v46 = vsel %vm3840_vm9, %v6983_v14, 0  ;;  %vm3841_vm7 = vcmp.ne.s16.totalorder %v7115_v3, 0  ;;  %vm7580_vm9 = vmmov %vm7570_vm1 }
 0x1ae   : > { %5409 = vmatprep.subr.bf16.mxu1 %v5749_v25  ;;  %v4259_v23 = vrot.slane %v4257_v35, 3  ;;  %v4241_v28 = vsel %vm3363_vm2, %v7014_v59, 0  ;;  %v4242_v21 = vsel %vm3364_vm14, %v7011_v5, 0  ;;  %v4262_v20 = vrot.slane %v4260_v22, 4  ;;  %vm7581_vm11 = vmmov %vm7570_vm1 }
 0x1af   : > { %v4255_v2 = vor.u32 %v4254_v43, %v4251_v53  ;;  %v4266_v0 = vshrl.u32 %v4241_v28, 16  ;;  %v4269_v48 = vshll.u32 %v4241_v28, 16  ;;  %v4275_v37 = vshrl.u32 %v4242_v21, 16 }
 0x1b0   : > { %v4278_v6 = vshll.u32 %v4242_v21, 16  ;;  %v7160_v50 = vsel %vm3525_vm13, %v3533_v32, %v6965_v29  ;;  %v4263_v55 = vor.u32 %v4262_v20, %v4259_v23  ;;  %v4477_v63 = vsel %vm3679_vm10, %v6983_v14, 0  ;;  %v5753_v20 = vld [vmem:[%s7363_s5 + $0x38] sm:$0xff]  }
 0x1b1   : > { %5410 = vmatpush3.bf16.msra.mxu1 %v5749_v25  ;;  %v7154_v25 = vor.u32 %v3719_v60, %v3716_v34  ;;  %v4268_v11 = vrot.slane %v4266_v0, 3  ;;  %v4476_v34 = vsel %vm4475_vm6, %v6995_v41, 0  ;;  %v4271_v60 = vrot.slane %v4269_v48, 4 }
 0x1b2   : > { %5419 = vmatprep.subr.bf16.mxu1 %v7126_v10  ;;  %v4277_v52 = vrot.slane %v4275_v37, 3  ;;  %v4280_v45 = vrot.slane %v4278_v6, 4  ;;  %v4486_v12 = vshrl.u32 %v4476_v34, 16  ;;  %vm7572_vm2 = vsmask.f32 4352 }
 0x1b3   : > { %v7170_v35 = vsel %vm7572_vm2, %v4255_v2, %v4263_v55  ;;  %v4489_v29 = vshll.u32 %v4476_v34, 16  ;;  %v4494_v32 = vshrl.u32 %v4477_v63, 16  ;;  %v4272_v53 = vor.u32 %v4271_v60, %v4268_v11  ;;  %vm7573_vm14 = vmmov %vm7572_vm2 }
 0x1b4   : > { %5404 = vmatmul.mubr.msk.bf16.gmra.mrb[0].mxu1 %vm2011_vm8, %v7119_v15  ;;  %v4281_v43 = vor.u32 %v4280_v45, %v4277_v52  ;;  %v4488_v22 = vrot.slane %v4486_v12, 4  ;;  %v4478_v8 = vsel %vm3680_vm12, %v7014_v59, 0  ;;  %vm7574_vm10 = vmmov %vm7572_vm2  ;;  %v4479_v34 = vsel %vm3681_vm5, %v7011_v5, 0 }
 0x1b5   : > { %5411 = vmatprep.mubr.msk.bf16.mxu1 %vm2011_vm8, %v3703_v47  ;;  %v4497_v47 = vshll.u32 %v4477_v63, 16  ;;  %v4491_v23 = vrot.slane %v4489_v29, 5  ;;  %v4496_v62 = vrot.slane %v4494_v32, 4  ;;  %v4503_v21 = vshrl.u32 %v4478_v8, 16  ;;  %vm7575_vm13 = vmmov %vm7572_vm2 }
 0x1b6   : > { %v7179_v2 = vsel %vm7573_vm14, %v4263_v55, %v4272_v53  ;;  %v7182_v0 = vsel %vm7574_vm10, %v4272_v53, %v4281_v43  ;;  %v7186_v48 = vsel %vm7575_vm13, %v4281_v43, %v6986_v30  ;;  %v4506_v31 = vshll.u32 %v4478_v8, 16  ;;  %vm7576_vm12 = vmmov %vm7570_vm1 }
 0x1b7   : > { %v4499_v28 = vrot.slane %v4497_v47, 5  ;;  %v4492_v37 = vor.u32 %v4491_v23, %v4488_v22  ;;  %v4505_v11 = vrot.slane %v4503_v21, 4  ;;  %v3721_v55 = vsel %vm7576_vm12, %v7111_v1, %v7154_v25  ;;  %vm7577_vm5 = vmmov %vm7570_vm1 }
 0x1b8   : > { %v4508_v63 = vrot.slane %v4506_v31, 5  ;;  %v4512_v60 = vshrl.u32 %v4479_v34, 16  ;;  %v4515_v52 = vshll.u32 %v4479_v34, 16  ;;  %v3845_v30 = vsel %vm3841_vm7, %v7014_v59, 0 }
 0x1b9   : > { %v4500_v6 = vor.u32 %v4499_v28, %v4496_v62  ;;  %v3838_v27 = vor.u32 %v7100_v4, %v3354_v36  ;;  %v3857_v1 = vshll.u32 %v7088_v44, 16  ;;  %v3729_v3 = vor.u32 %v7136_v57, %v7134_v18 }
 0x1ba   : > { %v4509_v45 = vor.u32 %v4508_v63, %v4505_v11  ;;  %v4514_v12 = vrot.slane %v4512_v60, 4  ;;  %v4517_v29 = vrot.slane %v4515_v52, 5  ;;  %v3862_v36 = vshrl.u32 %v7145_v46, 16 }
 0x1bb   : > { %v3859_v4 = vor.u32 %v3857_v1, %v7138_v24  ;;  %v3870_v32 = vshrl.u32 %v3845_v30, 16  ;;  %vm3842_vm0 = vcmp.ne.s16.totalorder %v3838_v27, 0  ;;  %v3730_v57 = vsel %vm7581_vm11, %v7154_v25, %v3729_v3  ;;  %v5757_v25 = vld [vmem:[%s7363_s5 + $0x48] sm:$0xff]   ;;  %v5762_v1 = vld [vmem:[%s7363_s5 + $0x60] sm:$0xff]  }
 0x1bc   : > { %5412 = vmatmul.mubr.msk.bf16.vlgmr.msra.gmra.mrb[4].mxu1 %vm2011_vm8, %v3712_v42  ;;  %v7204_v42 = vsel %vm7577_vm5, %v4492_v37, %v4500_v6  ;;  %v7216_v47 = vsel %vm7578_vm15, %v4500_v6, %v4509_v45  ;;  %v4518_v44 = vor.u32 %v4517_v29, %v4514_v12  ;;  %v3864_v43 = vrot.slane %v3862_v36, 7 }
 0x1bd   : > { %5420 = vmatpush3.bf16.msra.mxu1 %v7126_v10  ;;  %5415 = vmatprep.mubr.msk.bf16.mxu1 %vm2011_vm8, %v3721_v55  ;;  %v5755_v10 = vld [vmem:[%s7363_s5 + $0x40] sm:$0xff]   ;;  %vm7582_vm6 = vsmask.f32 256  ;;  %v3872_v8 = vrot.slane %v3870_v32, 7  ;;  %v3846_v23 = vsel %vm3842_vm0, %v7011_v5, 0  ;;  %v3865_v62 = vshll.u32 %v7145_v46, 16 }
 0x1be   : > { %5421 = vmatprep.subr.bf16.mxu1 %v5753_v20  ;;  %v7219_v53 = vsel %vm7579_vm4, %v4509_v45, %v4518_v44  ;;  %v7223_v18 = vsel %vm7580_vm9, %v4518_v44, %v7082_v58  ;;  %v3860_v22 = vsel %vm7582_vm6, %v3852_v40, %v3859_v4  ;;  %v3873_v28 = vshll.u32 %v3845_v30, 16  ;;  %vm7583_vm1 = vmmov %vm7582_vm6 }
 0x1bf   : > { %v3867_v21 = vor.u32 %v3865_v62, %v3864_v43  ;;  %v4084_v31 = vrot.slane %v3645_v17, 7  ;;  %vm7584_vm3 = vmmov %vm7583_vm1  ;;  %v3881_v46 = vshll.u32 %v3846_v23, 16  ;;  %v4086_v34 = vrot.slane %v3653_v7, 7  ;;  %v5758_v17 = vld [vmem:[%s7363_s5 + $0x50] sm:$0xff]  }
 0x1c0   : > { %v3875_v58 = vor.u32 %v3873_v28, %v3872_v8  ;;  %v4089_v63 = vrot.slane %v3662_v51, 7  ;;  %vm7585_vm2 = vmmov %vm7583_vm1  ;;  %vm7589_vm0 = vsmask.f32 7424  ;;  %v4139_v62 = vrot.slane %v7555_v9, 1  ;;  %v5766_v9 = vld [vmem:[%s7363_s5 + $0x80] sm:$0xff]  }
 0x1c1   : > { %5422 = vmatpush3.bf16.msra.mxu1 %v5753_v20  ;;  %v3878_v20 = vshrl.u32 %v3846_v23, 16  ;;  %v3868_v37 = vsel %vm7583_vm1, %v7138_v24, %v3867_v21  ;;  %v4085_v24 = vor.u32 %v4084_v31, %v3648_v56  ;;  %v4087_v60 = vor.u32 %v4086_v34, %v3656_v33  ;;  %vm7586_vm14 = vmmov %vm7583_vm1  ;;  %v5765_v21 = vld [vmem:[%s7363_s5 + $0x78] sm:$0xff]  }
 0x1c2   : > { %5431 = vmatprep.subr.bf16.mxu1 %v5755_v10  ;;  %v3876_v11 = vsel %vm7584_vm3, %v3864_v43, %v3875_v58  ;;  %v4090_v52 = vor.u32 %v4089_v63, %v3665_v19  ;;  %vm7587_vm10 = vmmov %vm7583_vm1  ;;  %v5761_v19 = vld [vmem:[%s7363_s5 + $0x58] sm:$0xff]  }
 0x1c3   : > { %v3880_v6 = vrot.slane %v3878_v20, 7  ;;  %vm4095_vm7 = vcmp.ne.s16.totalorder %v4085_v24, 0  ;;  %v4088_v49 = vsel %vm7586_vm14, %v4084_v31, %v4087_v60  ;;  %vm7588_vm5 = vmmov %vm7583_vm1 }
 0x1c4   : > { %5416 = vmatmul.mubr.msk.bf16.gmra.mrb[0].mxu1 %vm2011_vm8, %v3730_v57  ;;  %v4099_v56 = vsel %vm4095_vm7, %v6995_v41, 0  ;;  %v4091_v33 = vsel %vm7587_vm10, %v4086_v34, %v4090_v52  ;;  %vm4096_vm13 = vcmp.ne.s16.totalorder %v4088_v49, 0  ;;  %v4094_v54 = vsel %vm7588_vm5, %v4089_v63, %v4093_v61  ;;  %v5763_v57 = vld [vmem:[%s7363_s5 + $0x68] sm:$0xff]   ;;  %vm7590_vm4 = vmmov %vm7589_vm0 }
 0x1c5   : > { %5423 = vmatprep.mubr.msk.bf16.mxu1 %vm2011_vm8, %v3860_v22  ;;  %v3883_v55 = vor.u32 %v3881_v46, %v3880_v6  ;;  %v4111_v51 = vshll.u32 %v4099_v56, 16  ;;  %vm4097_vm12 = vcmp.ne.s16.totalorder %v4091_v33, 0  ;;  %v4100_v30 = vsel %vm4096_vm13, %v6983_v14, 0  ;;  %vm7591_vm9 = vmmov %vm7589_vm0 }
 0x1c6   : > { %v4101_v38 = vsel %vm4097_vm12, %v7014_v59, 0  ;;  %v4109_v39 = vshrl.u32 %v4099_v56, 16  ;;  %v4116_v27 = vshll.u32 %v4100_v30, 16  ;;  %vm4098_vm15 = vcmp.ne.s16.totalorder %v4094_v54, 0  ;;  %vm7592_vm11 = vmmov %vm7589_vm0 }
 0x1c7   : > { %v3884_v7 = vsel %vm7585_vm2, %v3872_v8, %v3883_v55  ;;  %v4124_v45 = vshll.u32 %v4101_v38, 16  ;;  %v4102_v12 = vsel %vm4098_vm15, %v7011_v5, 0  ;;  %v4128_v3 = vshrl.u32 %v4101_v38, 16  ;;  %v5764_v8 = vld [vmem:[%s7363_s5 + $0x70] sm:$0xff]  }
 0x1c8   : > { %v4132_v40 = vshll.u32 %v4102_v12, 16  ;;  %v4120_v36 = vshrl.u32 %v4100_v30, 16  ;;  %v4136_v22 = vshrl.u32 %v4102_v12, 16 }
 0x1c9   : > { %v4126_v29 = vrot.slane %v4124_v45, 1 }
 0x1ca   : > { %v4134_v44 = vrot.slane %v4132_v40, 1 }
 0x1cb   : > { %v4130_v4 = vor.u32 %v4128_v3, %v4126_v29 }
 0x1cc   : > { %5424 = vmatmul.mubr.msk.bf16.vlgmr.msra.gmra.mrb[4].mxu1 %vm2011_vm8, %v3868_v37  ;;  %v4138_v23 = vor.u32 %v4136_v22, %v4134_v44 }
 0x1cd   : > { %5432 = vmatpush3.bf16.msra.mxu1 %v5755_v10  ;;  %5427 = vmatprep.mubr.msk.bf16.mxu1 %vm2011_vm8, %v3876_v11 }
 0x1ce   : > { %5433 = vmatprep.subr.bf16.mxu1 %v5757_v25  ;;  %v4140_v28 = vsel %vm7592_vm11, %v4138_v23, %v4139_v62 }
 0x1d1   : > { %5434 = vmatpush3.bf16.msra.mxu1 %v5757_v25 }
 0x1d2   : > { %5443 = vmatprep.subr.bf16.mxu1 %v5758_v17 }
 0x1d4   : > { %5428 = vmatmul.mubr.msk.bf16.gmra.mrb[0].mxu1 %vm2011_vm8, %v3884_v7 }
 0x1d5   : > { %5435 = vmatprep.mubr.msk.bf16.mxu1 %vm2011_vm8, %v6995_v41  ;;  %v4113_v41 = vrot.slane %v4111_v51, 1 }
 0x1d7   : > { %v4114_v10 = vor.u32 %v4113_v41, %v4109_v39 }
 0x1dc   : > { %5436 = vmatmul.mubr.msk.bf16.vlgmr.msra.gmra.mrb[4].mxu1 %vm2011_vm8, %v6983_v14  ;;  %v4118_v14 = vrot.slane %v4116_v27, 1 }
 0x1dd   : > { %5444 = vmatpush3.bf16.msra.mxu1 %v5758_v17  ;;  %5439 = vmatprep.mubr.msk.bf16.mxu1 %vm2011_vm8, %v7014_v59 }
 0x1de   : > { %5445 = vmatprep.subr.bf16.mxu1 %v5761_v19  ;;  %v4119_v59 = vsel %vm7589_vm0, %v4114_v10, %v4118_v14  ;;  %v4122_v32 = vor.u32 %v4120_v36, %v4118_v14 }
 0x1e0   : > { %v4127_v43 = vsel %vm7590_vm4, %v4122_v32, %v4126_v29 }
 0x1e1   : > { %5446 = vmatpush3.bf16.msra.mxu1 %v5761_v19 }
 0x1e2   : > { %5455 = vmatprep.subr.bf16.mxu1 %v5762_v1 }
 0x1e4   : > { %5440 = vmatmul.mubr.msk.bf16.gmra.mrb[0].mxu1 %vm2011_vm8, %v7011_v5  ;;  %v4135_v5 = vsel %vm7591_vm9, %v4130_v4, %v4134_v44 }
 0x1e5   : > { %5447 = vmatprep.mubr.msk.bf16.mxu1 %vm2011_vm8, %v4119_v59 }
 0x1ec   : > { %5448 = vmatmul.mubr.msk.bf16.vlgmr.msra.gmra.mrb[4].mxu1 %vm2011_vm8, %v4127_v43 }
 0x1ed   : > { %5456 = vmatpush3.bf16.msra.mxu1 %v5762_v1  ;;  %5451 = vmatprep.mubr.msk.bf16.mxu1 %vm2011_vm8, %v4135_v5 }
 0x1ee   : > { %5457 = vmatprep.subr.bf16.mxu1 %v5763_v57 }
 0x1f1   : > { %5458 = vmatpush3.bf16.msra.mxu1 %v5763_v57 }
 0x1f2   : > { %5467 = vmatprep.subr.bf16.mxu1 %v5764_v8 }
 0x1f4   : > { %5452 = vmatmul.mubr.msk.bf16.gmra.mrb[0].mxu1 %vm2011_vm8, %v4140_v28 }
 0x1f5   : > { %5459 = vmatprep.mubr.msk.bf16.mxu1 %vm2011_vm8, %v7170_v35  ;;  %v5767_v35 = vld [vmem:[%s7363_s5 + $0x88] sm:$0xff]  }
 0x1fc   : > { %5460 = vmatmul.mubr.msk.bf16.vlgmr.msra.gmra.mrb[4].mxu1 %vm2011_vm8, %v7179_v2 }
 0x1fd   : > { %5468 = vmatpush3.bf16.msra.mxu1 %v5764_v8  ;;  %5463 = vmatprep.mubr.msk.bf16.mxu1 %vm2011_vm8, %v7182_v0 }
 0x1fe   : > { %5469 = vmatprep.subr.bf16.mxu1 %v5765_v21 }
 0x201   : > { %5470 = vmatpush3.bf16.msra.mxu1 %v5765_v21 }
 0x202   : > { %5479 = vmatprep.subr.bf16.mxu1 %v5766_v9 }
 0x204   : > { %5464 = vmatmul.mubr.msk.bf16.gmra.mrb[0].mxu1 %vm2011_vm8, %v7186_v48 }
 0x205   : > { %5471 = vmatprep.mubr.msk.bf16.mxu1 %vm2011_vm8, %v7096_v16  ;;  %v5321_v16 = vpop.f32.mrb[12].mxu0 }
 0x20c   : > { %5472 = vmatmul.mubr.msk.bf16.vlgmr.msra.gmra.mrb[4].mxu1 %vm2011_vm8, %v7106_v13  ;;  %v2570_v13 = vpop.f32.mrb[13].mxu0 }
 0x20d   : > { %5480 = vmatpush3.bf16.msra.mxu1 %v5766_v9  ;;  %5475 = vmatprep.mubr.msk.bf16.mxu1 %vm2011_vm8, %v7119_v15  ;;  %v5322_v15 = vpop.f32.mrb[14].mxu0 }
 0x20e   : > { %5481 = vmatprep.subr.bf16.mxu1 %v5767_v35  ;;  %v2573_v2 = vpop.f32.mrb[15].mxu0 }
 0x20f   : > { %v5329_v0 = vpop.f32.mrb[8].mxu0 }
 0x210   : > { %v2662_v48 = vpop.f32.mrb[9].mxu0 }
 0x211   : > { %5482 = vmatpush3.bf16.msra.mxu1 %v5767_v35  ;;  %v5330_v20 = vpop.f32.mrb[10].mxu0 }
 0x214   : > { %5476 = vmatmul.mubr.msk.bf16.gmra.mrb[0].mxu1 %vm2011_vm8, %v7160_v50  ;;  %v2665_v50 = vpop.f32.mrb[11].mxu0 }
 0x215   : > { %5483 = vmatprep.mubr.msk.bf16.mxu1 %vm2011_vm8, %v7204_v42  ;;  %v5028_v42 = vld [vmem:[%s7364_s6] ss:$0 sm:$0xff] }
 0x21c   : > { %5484 = vmatmul.mubr.msk.bf16.vlgmr.msra.gmra.mrb[4].mxu1 %vm2011_vm8, %v7216_v47 }
 0x21d   : > { %5487 = vmatprep.mubr.msk.bf16.mxu1 %vm2011_vm8, %v7219_v53 }
 0x224   : > { %5488 = vmatmul.mubr.msk.bf16.gmra.mrb[0].mxu1 %vm2011_vm8, %v7223_v18 }
 0x2ef   : > { %v5485_v58 = vpop.f32.mrb[4].mxu1 }
 0x2f0   : > { %v5495_v47 = vadd.f32 %v5485_v58, %v5329_v0  ;;  %v4579_v25 = vpop.f32.mrb[5].mxu1 }
 0x2f1   : > { %v5496_v53 = vadd.f32 %v4579_v25, %v2662_v48  ;;  %v5486_v31 = vpop.f32.mrb[6].mxu1 }
 0x2f2   : > { %v4627_v37 = vadd.f32 %v5495_v47, %v5028_v42  ;;  %v5497_v18 = vadd.f32 %v5486_v31, %v5330_v20  ;;  %v4582_v6 = vpop.f32.mrb[7].mxu1 }
 0x2f3   : > { %v4625_v11 = vadd.f32 %v5496_v53, %v5028_v42  ;;  %v5498_v46 = vadd.f32 %v4582_v6, %v2665_v50 }
 0x2f4   : > { %v4635_v34 = vmax.f32 %v4627_v37, 0.0  ;;  %v4628_v17 = vadd.f32 %v5497_v18, %v5028_v42 }
 0x2f5   : > { %v4633_v24 = vmax.f32 %v4625_v11, 0.0  ;;  %v4626_v55 = vadd.f32 %v5498_v46, %v5028_v42 }
 0x2f6   : > { %4643 = vst.msk [vmem:[%s7337_s29 + $0x10] sm:$0xff] %vm2011_vm8, %v4635_v34  ;;  %v4636_v63 = vmax.f32 %v4628_v17, 0.0 }
 0x2f7   : > { %4641 = vst.msk [vmem:[%s7337_s29] sm:$0xff] %vm2011_vm8, %v4633_v24  ;;  %v4634_v60 = vmax.f32 %v4626_v55, 0.0  ;;  %v5489_v7 = vpop.f32.mrb[0].mxu1 }
 0x2f8   : > { %4644 = vst.msk [vmem:[%s7337_s29 + $0x18] sm:$0xff] %vm2011_vm8, %v4636_v63  ;;  %v5499_v52 = vadd.f32 %v5489_v7, %v5321_v16  ;;  %v4595_v49 = vpop.f32.mrb[1].mxu1 }
 0x2f9   : > { %4642 = vst.msk [vmem:[%s7337_s29 + $0x8] sm:$0xff] %vm2011_vm8, %v4634_v60  ;;  %v5500_v56 = vadd.f32 %v4595_v49, %v2570_v13  ;;  %v5490_v26 = vpop.f32.mrb[2].mxu1 }
 0x2fa   : > { %v4631_v33 = vadd.f32 %v5499_v52, %v5028_v42  ;;  %v5501_v51 = vadd.f32 %v5490_v26, %v5322_v15  ;;  %v4598_v61 = vpop.f32.mrb[3].mxu1 }
 0x2fb   : > { %v4629_v19 = vadd.f32 %v5500_v56, %v5028_v42  ;;  %v5502_v30 = vadd.f32 %v4598_v61, %v2573_v2 }
 0x2fc   : > { %v4639_v41 = vmax.f32 %v4631_v33, 0.0  ;;  %v4632_v38 = vadd.f32 %v5501_v51, %v5028_v42 }
 0x2fd   : > { %v4637_v54 = vmax.f32 %v4629_v19, 0.0  ;;  %v4630_v39 = vadd.f32 %v5502_v30, %v5028_v42 }
 0x2fe   : > { %4647 = vst.msk [vmem:[%s7337_s29 + $0x30] sm:$0xff] %vm2011_vm8, %v4639_v41  ;;  %v4640_v27 = vmax.f32 %v4632_v38, 0.0 }
 0x2ff   : > { %4645 = vst.msk [vmem:[%s7337_s29 + $0x20] sm:$0xff] %vm2011_vm8, %v4637_v54  ;;  %v4638_v1 = vmax.f32 %v4630_v39, 0.0 }
 0x300   : > { %4648 = vst.msk [vmem:[%s7337_s29 + $0x38] sm:$0xff] %vm2011_vm8, %v4640_v27 }
 0x301   : > { %4646 = vst.msk [vmem:[%s7337_s29 + $0x28] sm:$0xff] %vm2011_vm8, %v4638_v1 }
 0x302 PF: > { %s17_s24 = sadd.s32 1, %s5782_s24  }
 0x303   : > { %p14_p4 = scmp.ge.s32.totalorder %s17_s24, 4  }
 0x305   :  { %16 = sbr.rel (!%p14_p4) target bundleno = 1 (0x1), region = 105 }

</bundles_post_ra>
